<compile_context>
chip_gen: v7x
topology: tpu7x:2x2x1
jax: 0.10.0
libtpu: 0.0.40
codegen_flags: <defaults>
</compile_context>

<pallas_src>
import numpy as np
import jax
import jax.numpy as jnp
from jax.experimental import pallas as pl
from jax.experimental.pallas import tpu as pltpu


# ---------------------------------------------------------------------------
# Model hyper-parameters (defaults of Mymodel.__init__)
# ---------------------------------------------------------------------------
HID1, HID2, HID3, HID4, HID5, HID6 = 70, 155, 85, 175, 20, 95
RC1, RC2, RC3, RC4, RC5 = 0, 0, 1, 1, 0

# (in_dim, out_dim) for every nn.Linear, raw-parameter order:
# fc1_1..fc1_6, fc2_1..fc2_4, fc1, fc2, fc3, fc4
LAYER_DIMS = [
    (13, HID1), (HID1, HID2), (HID2, HID2), (HID2, HID3), (HID3, HID3), (HID3, 1),
    (13, HID4), (HID4, HID5), (HID5, HID5), (HID5, 1),
    (2, HID6), (HID6, HID6), (HID6, 2), (2, 2),
]

F = 256          # blob width (max padded dim)
X_PAD = 128      # padded input width (>= 13)
F_OUT = 128      # lane-dense output width (real outputs are lanes 0..1)
B2_OFF = 81      # branch-2 (fc2_1) output lives in lanes 81..255 of the fused act

# Packed layer table: (entries, K_pad, N_pad)
#   entries = [(raw_layer_idx, row_offset, col_offset), ...]
PACKED = [
    ([(0, 0, 0), (6, 0, B2_OFF)], 128, 256),  # 0: fused fc1_1 | fc2_1
    ([(1, 0, 0)], 128, 256),                  # 1: fc1_2  (70 -> 155)
    ([(2, 0, 0)], 256, 256),                  # 2: fc1_3  (155 -> 155)
    ([(3, 0, 0)], 256, 128),                  # 3: fc1_4  (155 -> 85)
    ([(4, 0, 0)], 128, 128),                  # 4: fc1_5  (85 -> 85)
    ([(5, 0, 0)], 128, 128),                  # 5: fc1_6  (85 -> 1)  -> lane 0
    ([(7, B2_OFF, 0)], 256, 128),             # 6: fc2_2  (175 -> 20), rows 81..255
    ([(8, 0, 0)], 128, 128),                  # 7: fc2_3  (20 -> 20)
    ([(9, 0, 1)], 128, 128),                  # 8: fc2_4  (20 -> 1)  -> lane 1
    ([(10, 0, 0)], 128, 128),                 # 9: fc1    (2 -> 95)
    ([(11, 0, 0)], 128, 128),                 # 10: fc2   (95 -> 95)
    ([(12, 0, 0)], 128, 128),                 # 11: fc3   (95 -> 2)
    ([(13, 0, 0)], 128, 128),                 # 12: fc4   (2 -> 2)
]
NP = len(PACKED)                              # 13 packed slots
K_PAD = tuple(k for _, k, _ in PACKED)
N_PAD = tuple(n for _, _, n in PACKED)


def _round_up(n, m):
    return ((n + m - 1) // m) * m


# ---------------------------------------------------------------------------
# Kernel: whole forward pass fused; one batch tile per grid step.
# ---------------------------------------------------------------------------
def _mymodel_kernel(x_ref, w_ref, b_ref, o_ref):
    def linear(h, idx):
        # Static 128-aligned K/N slices of the packed blob; bf16 operands for
        # the MXU, f32 accumulation + f32 bias add.
        k, n = K_PAD[idx], N_PAD[idx]
        hb = h.astype(jnp.bfloat16)
        acc = jnp.dot(hb, w_ref[idx, :k, :n], preferred_element_type=jnp.float32)
        return acc + b_ref[idx, :, :n]                     # [1, n] f32 broadcast

    def relu(h):
        return jnp.maximum(h, 0.0)

    x = x_ref[...]                                         # [TB, 128] bf16

    # ---- fused prologue: fc1_1 (lanes 0..69) | fc2_1 (lanes 81..255) ------
    h0 = relu(linear(x, 0))                                # [TB, 256] f32

    # ---- branch 1 ----------------------------------------------------------
    out1 = relu(linear(h0[:, :128], 1))                    # fc1_2 -> [TB, 256]
    h = relu(linear(out1, 2))                              # fc1_3
    if RC1 == 1:
        h = h + out1
    out2 = relu(linear(h, 3))                              # fc1_4 -> [TB, 128]
    h = relu(linear(out2, 4))                              # fc1_5
    if RC2 == 1:
        h = h + out2
    xb = linear(h, 5)                                      # fc1_6 -> real lane 0
    # TODO(synk): nn.Dropout (drop1/drop2/drop3) are identity at inference time.

    # ---- branch 2 (input lanes 81..255 of h0; weight rows 0..80 are zero) --
    y1 = relu(linear(h0, 6))                               # fc2_2 -> [TB, 128]
    g = relu(linear(y1, 7))                                # fc2_3
    if RC5 == 1:
        g = g + y1
    yb = linear(g, 8)                                      # fc2_4 -> real lane 1

    # ---- head --------------------------------------------------------------
    out3 = xb + yb                                         # == concat([xb, yb], axis=1)
    out4 = relu(linear(out3, 9))                           # fc1
    o = relu(linear(out4, 10))                             # fc2
    if RC3 == 1:
        o = o + out4
    o = relu(linear(o, 11))                                # fc3
    if RC4 == 1:
        o = o + out3
    o = linear(o, 12)                                      # fc4 -> real lanes 0..1

    # Lane-dense store of the full 128-wide value; wrapper slices [:, :2].
    o_ref[...] = o.astype(o_ref.dtype)


# ---------------------------------------------------------------------------
# Wrapper
# ---------------------------------------------------------------------------
def mymodel_forward(x, wblob, bblob, *, block_b=512):
    """x: [B, 13] float.  wblob: [13,256,256] bf16.  bblob: [13,1,256] f32."""
    B = x.shape[0]
    # Cap the tile so the grid has >= 2 steps whenever B permits (lets the
    # "parallel" batch axis be sharded across v7x's 2 TensorCores).
    half = _round_up(max((B + 1) // 2, 1), 8)
    tb = max(8, min(block_b, half))
    Bp = _round_up(B, tb)
    nb = Bp // tb

    # Pre-pad batch + features, in bf16 (padded weight rows are zero, so the
    # padded lanes never contribute).
    xp = jnp.zeros((Bp, X_PAD), jnp.bfloat16).at[:B, : x.shape[1]].set(
        x.astype(jnp.bfloat16)
    )

    grid_spec = pltpu.PrefetchScalarGridSpec(
        num_scalar_prefetch=0,
        grid=(nb,),
        in_specs=[
            pl.BlockSpec((tb, X_PAD), lambda i: (i, 0)),    # x tile (pipelined)
            pl.BlockSpec((NP, F, F), lambda i: (0, 0, 0)),  # weights, VMEM-resident
            pl.BlockSpec((NP, 1, F), lambda i: (0, 0, 0)),  # biases, VMEM-resident
        ],
        out_specs=pl.BlockSpec((tb, F_OUT), lambda i: (i, 0)),
    )

    out = pl.pallas_call(
        _mymodel_kernel,
        out_shape=jax.ShapeDtypeStruct((Bp, F_OUT), jnp.float32),
        grid_spec=grid_spec,
        compiler_params=pltpu.CompilerParams(
            dimension_semantics=("parallel",),   # batch tiles independent
            vmem_limit_bytes=32 << 20,           # actual use is only a few MiB
        ),
    )(xp, wblob, bblob)
    return out[:B, :2]


# ---------------------------------------------------------------------------
# Parameter construction / packing
# ---------------------------------------------------------------------------
def init_raw_params(key):
    """PyTorch-style U(-1/sqrt(fan_in), 1/sqrt(fan_in)) init.

    Weights stored as [in, out] (pre-transposed), biases as [out].
    """
    weights, biases = [], []
    for i, (fan_in, fan_out) in enumerate(LAYER_DIMS):
        kw, kb = jax.random.split(jax.random.fold_in(key, i))
        bound = 1.0 / float(np.sqrt(fan_in))
        w = jax.random.uniform(kw, (fan_in, fan_out), jnp.float32, -bound, bound)
        b = jax.random.uniform(kb, (fan_out,), jnp.float32, -bound, bound)
        weights.append(w)
        biases.append(b)
    return weights, biases


def pack_params(weights, biases):
    """Pack the 14 raw (weight, bias) pairs into 13 zero-padded blob slots."""
    wblob = np.zeros((NP, F, F), np.float32)
    bblob = np.zeros((NP, 1, F), np.float32)
    for slot, (entries, _, _) in enumerate(PACKED):
        for raw_idx, r_off, c_off in entries:
            w = np.asarray(weights[raw_idx], np.float32)
            b = np.asarray(biases[raw_idx], np.float32)
            cin, cout = w.shape
            wblob[slot, r_off:r_off + cin, c_off:c_off + cout] = w
            bblob[slot, 0, c_off:c_off + cout] = b
    return jnp.asarray(wblob, jnp.bfloat16), jnp.asarray(bblob, jnp.float32)


# ---------------------------------------------------------------------------
# Pure-JAX reference (original unpadded math; weights rounded to bf16 to match
# the kernel's weight precision — only in-kernel activation rounding differs).
# ---------------------------------------------------------------------------
def reference_forward(x, weights, biases):
    wq = [w.astype(jnp.bfloat16).astype(jnp.float32) for w in weights]

    def lin(h, i):
        return h @ wq[i] + biases[i]

    relu = lambda h: jnp.maximum(h, 0.0)
    h = relu(lin(x, 0)); out1 = relu(lin(h, 1)); h = relu(lin(out1, 2))
    out2 = relu(lin(h + out1 if RC1 == 1 else h, 3))
    h = relu(lin(out2, 4))
    xb = lin(h + out2 if RC2 == 1 else h, 5)
    g = relu(lin(x, 6)); y1 = relu(lin(g, 7)); g = relu(lin(y1, 8))
    yb = lin(g + y1 if RC5 == 1 else g, 9)
    out3 = jnp.concatenate([xb, yb], axis=1)
    out4 = relu(lin(out3, 10))
    o = relu(lin(out4, 11))
    o = relu(lin(o + out4 if RC3 == 1 else o, 12))
    o = lin(o + out3 if RC4 == 1 else o, 13)
    return o


if __name__ == "__main__":
    key = jax.random.PRNGKey(0)
    k_x, k_p = jax.random.split(key)

    B = 64                                     # small demo batch -> grid=(2,)
    x = jax.random.normal(k_x, (B, 13), jnp.float32)
    weights, biases = init_raw_params(k_p)
    wblob, bblob = pack_params(weights, biases)

    out = mymodel_forward(x, wblob, bblob)
    out = jax.block_until_ready(out)

    ref = reference_forward(x, weights, biases)
    assert out.shape == (B, 2), out.shape
    assert jnp.allclose(out, ref, atol=2e-2, rtol=2e-2), (
        "mismatch vs reference: max abs diff = %f" % float(jnp.max(jnp.abs(out - ref)))
    )

    print("KERNEL_OK")
</pallas_src>

<mosaic_0001>
module attributes {stable_mosaic.version = 11 : i64} {
  func.func @_mymodel_kernel(%arg0: i32, %arg1: memref<32x128xbf16, #tpu.memory_space<vmem>>, %arg2: memref<13x256x256xbf16, #tpu.memory_space<vmem>>, %arg3: memref<13x1x256xf32, #tpu.memory_space<vmem>>, %arg4: memref<32x128xf32, #tpu.memory_space<vmem>>) attributes {dimension_semantics = [#tpu.dimension_semantics<parallel>], iteration_bounds = array<i64: 2>, scalar_prefetch = 0 : i64, scratch_operands = 0 : i64, tpu.core_type = #tpu.core_type<tc>, window_params = [{transform_indices = @transform_0, window_bounds = array<i64: 32, 128>}, {pipeline_mode = #tpu.pipeline_mode<synchronous>, transform_indices = @transform_1, window_bounds = array<i64: 13, 256, 256>}, {pipeline_mode = #tpu.pipeline_mode<synchronous>, transform_indices = @transform_2, window_bounds = array<i64: 13, 1, 256>}, {transform_indices = @transform_3, window_bounds = array<i64: 32, 128>}]} {
    %c0 = arith.constant 0 : index
    %c0_0 = arith.constant 0 : index
    %0 = vector.load %arg1[%c0, %c0_0] : memref<32x128xbf16, #tpu.memory_space<vmem>>, vector<32x128xbf16>
    %c0_1 = arith.constant 0 : index
    %c0_2 = arith.constant 0 : index
    %c0_3 = arith.constant 0 : index
    %1 = vector.load %arg2[%c0_1, %c0_2, %c0_3] : memref<13x256x256xbf16, #tpu.memory_space<vmem>>, vector<1x128x256xbf16>
    %2 = vector.shape_cast %1 : vector<1x128x256xbf16> to vector<128x256xbf16>
    %cst = arith.constant dense<0.000000e+00> : vector<32x256xf32>
    %3 = tpu.matmul %0, %2, %cst {dimension_numbers = #tpu.dot_dimension_numbers<[1], [0], [0], [1], [0, 0, 1, 1], [], []>} : vector<32x128xbf16>, vector<128x256xbf16>, vector<32x256xf32> -> vector<32x256xf32>
    %c0_4 = arith.constant 0 : index
    %c0_5 = arith.constant 0 : index
    %c0_6 = arith.constant 0 : index
    %4 = vector.load %arg3[%c0_4, %c0_5, %c0_6] : memref<13x1x256xf32, #tpu.memory_space<vmem>>, vector<1x1x256xf32>
    %5 = vector.shape_cast %4 : vector<1x1x256xf32> to vector<1x256xf32>
    %6 = vector.broadcast %5 : vector<1x256xf32> to vector<32x256xf32>
    %7 = arith.addf %3, %6 : vector<32x256xf32>
    %cst_7 = arith.constant 0.000000e+00 : f32
    %8 = vector.broadcast %cst_7 : f32 to vector<32x256xf32>
    %9 = arith.maximumf %7, %8 : vector<32x256xf32>
    %10 = vector.extract_strided_slice %9 {offsets = [0, 0], sizes = [32, 128], strides = [1, 1]} : vector<32x256xf32> to vector<32x128xf32>
    %11 = arith.truncf %10 : vector<32x128xf32> to vector<32x128xbf16>
    %c1 = arith.constant 1 : index
    %c0_8 = arith.constant 0 : index
    %c0_9 = arith.constant 0 : index
    %12 = vector.load %arg2[%c1, %c0_8, %c0_9] : memref<13x256x256xbf16, #tpu.memory_space<vmem>>, vector<1x128x256xbf16>
    %13 = vector.shape_cast %12 : vector<1x128x256xbf16> to vector<128x256xbf16>
    %cst_10 = arith.constant dense<0.000000e+00> : vector<32x256xf32>
    %14 = tpu.matmul %11, %13, %cst_10 {dimension_numbers = #tpu.dot_dimension_numbers<[1], [0], [0], [1], [0, 0, 1, 1], [], []>} : vector<32x128xbf16>, vector<128x256xbf16>, vector<32x256xf32> -> vector<32x256xf32>
    %c1_11 = arith.constant 1 : index
    %c0_12 = arith.constant 0 : index
    %c0_13 = arith.constant 0 : index
    %15 = vector.load %arg3[%c1_11, %c0_12, %c0_13] : memref<13x1x256xf32, #tpu.memory_space<vmem>>, vector<1x1x256xf32>
    %16 = vector.shape_cast %15 : vector<1x1x256xf32> to vector<1x256xf32>
    %17 = vector.broadcast %16 : vector<1x256xf32> to vector<32x256xf32>
    %18 = arith.addf %14, %17 : vector<32x256xf32>
    %cst_14 = arith.constant 0.000000e+00 : f32
    %19 = vector.broadcast %cst_14 : f32 to vector<32x256xf32>
    %20 = arith.maximumf %18, %19 : vector<32x256xf32>
    %21 = arith.truncf %20 : vector<32x256xf32> to vector<32x256xbf16>
    %c2 = arith.constant 2 : index
    %c0_15 = arith.constant 0 : index
    %c0_16 = arith.constant 0 : index
    %22 = vector.load %arg2[%c2, %c0_15, %c0_16] : memref<13x256x256xbf16, #tpu.memory_space<vmem>>, vector<1x256x256xbf16>
    %23 = vector.shape_cast %22 : vector<1x256x256xbf16> to vector<256x256xbf16>
    %cst_17 = arith.constant dense<0.000000e+00> : vector<32x256xf32>
    %24 = tpu.matmul %21, %23, %cst_17 {dimension_numbers = #tpu.dot_dimension_numbers<[1], [0], [0], [1], [0, 0, 1, 1], [], []>} : vector<32x256xbf16>, vector<256x256xbf16>, vector<32x256xf32> -> vector<32x256xf32>
    %c2_18 = arith.constant 2 : index
    %c0_19 = arith.constant 0 : index
    %c0_20 = arith.constant 0 : index
    %25 = vector.load %arg3[%c2_18, %c0_19, %c0_20] : memref<13x1x256xf32, #tpu.memory_space<vmem>>, vector<1x1x256xf32>
    %26 = vector.shape_cast %25 : vector<1x1x256xf32> to vector<1x256xf32>
    %27 = vector.broadcast %26 : vector<1x256xf32> to vector<32x256xf32>
    %28 = arith.addf %24, %27 : vector<32x256xf32>
    %cst_21 = arith.constant 0.000000e+00 : f32
    %29 = vector.broadcast %cst_21 : f32 to vector<32x256xf32>
    %30 = arith.maximumf %28, %29 : vector<32x256xf32>
    %31 = arith.truncf %30 : vector<32x256xf32> to vector<32x256xbf16>
    %c3 = arith.constant 3 : index
    %c0_22 = arith.constant 0 : index
    %c0_23 = arith.constant 0 : index
    %32 = vector.load %arg2[%c3, %c0_22, %c0_23] : memref<13x256x256xbf16, #tpu.memory_space<vmem>>, vector<1x256x128xbf16>
    %33 = vector.shape_cast %32 : vector<1x256x128xbf16> to vector<256x128xbf16>
    %cst_24 = arith.constant dense<0.000000e+00> : vector<32x128xf32>
    %34 = tpu.matmul %31, %33, %cst_24 {dimension_numbers = #tpu.dot_dimension_numbers<[1], [0], [0], [1], [0, 0, 1, 1], [], []>} : vector<32x256xbf16>, vector<256x128xbf16>, vector<32x128xf32> -> vector<32x128xf32>
    %c3_25 = arith.constant 3 : index
    %c0_26 = arith.constant 0 : index
    %c0_27 = arith.constant 0 : index
    %35 = vector.load %arg3[%c3_25, %c0_26, %c0_27] : memref<13x1x256xf32, #tpu.memory_space<vmem>>, vector<1x1x128xf32>
    %36 = vector.shape_cast %35 : vector<1x1x128xf32> to vector<1x128xf32>
    %37 = vector.broadcast %36 : vector<1x128xf32> to vector<32x128xf32>
    %38 = arith.addf %34, %37 : vector<32x128xf32>
    %cst_28 = arith.constant 0.000000e+00 : f32
    %39 = vector.broadcast %cst_28 : f32 to vector<32x128xf32>
    %40 = arith.maximumf %38, %39 : vector<32x128xf32>
    %41 = arith.truncf %40 : vector<32x128xf32> to vector<32x128xbf16>
    %c4 = arith.constant 4 : index
    %c0_29 = arith.constant 0 : index
    %c0_30 = arith.constant 0 : index
    %42 = vector.load %arg2[%c4, %c0_29, %c0_30] : memref<13x256x256xbf16, #tpu.memory_space<vmem>>, vector<1x128x128xbf16>
    %43 = vector.shape_cast %42 : vector<1x128x128xbf16> to vector<128x128xbf16>
    %cst_31 = arith.constant dense<0.000000e+00> : vector<32x128xf32>
    %44 = tpu.matmul %41, %43, %cst_31 {dimension_numbers = #tpu.dot_dimension_numbers<[1], [0], [0], [1], [0, 0, 1, 1], [], []>} : vector<32x128xbf16>, vector<128x128xbf16>, vector<32x128xf32> -> vector<32x128xf32>
    %c4_32 = arith.constant 4 : index
    %c0_33 = arith.constant 0 : index
    %c0_34 = arith.constant 0 : index
    %45 = vector.load %arg3[%c4_32, %c0_33, %c0_34] : memref<13x1x256xf32, #tpu.memory_space<vmem>>, vector<1x1x128xf32>
    %46 = vector.shape_cast %45 : vector<1x1x128xf32> to vector<1x128xf32>
    %47 = vector.broadcast %46 : vector<1x128xf32> to vector<32x128xf32>
    %48 = arith.addf %44, %47 : vector<32x128xf32>
    %cst_35 = arith.constant 0.000000e+00 : f32
    %49 = vector.broadcast %cst_35 : f32 to vector<32x128xf32>
    %50 = arith.maximumf %48, %49 : vector<32x128xf32>
    %51 = arith.truncf %50 : vector<32x128xf32> to vector<32x128xbf16>
    %c5 = arith.constant 5 : index
    %c0_36 = arith.constant 0 : index
    %c0_37 = arith.constant 0 : index
    %52 = vector.load %arg2[%c5, %c0_36, %c0_37] : memref<13x256x256xbf16, #tpu.memory_space<vmem>>, vector<1x128x128xbf16>
    %53 = vector.shape_cast %52 : vector<1x128x128xbf16> to vector<128x128xbf16>
    %cst_38 = arith.constant dense<0.000000e+00> : vector<32x128xf32>
    %54 = tpu.matmul %51, %53, %cst_38 {dimension_numbers = #tpu.dot_dimension_numbers<[1], [0], [0], [1], [0, 0, 1, 1], [], []>} : vector<32x128xbf16>, vector<128x128xbf16>, vector<32x128xf32> -> vector<32x128xf32>
    %c5_39 = arith.constant 5 : index
    %c0_40 = arith.constant 0 : index
    %c0_41 = arith.constant 0 : index
    %55 = vector.load %arg3[%c5_39, %c0_40, %c0_41] : memref<13x1x256xf32, #tpu.memory_space<vmem>>, vector<1x1x128xf32>
    %56 = vector.shape_cast %55 : vector<1x1x128xf32> to vector<1x128xf32>
    %57 = vector.broadcast %56 : vector<1x128xf32> to vector<32x128xf32>
    %58 = arith.addf %54, %57 : vector<32x128xf32>
    %59 = arith.truncf %9 : vector<32x256xf32> to vector<32x256xbf16>
    %c6 = arith.constant 6 : index
    %c0_42 = arith.constant 0 : index
    %c0_43 = arith.constant 0 : index
    %60 = vector.load %arg2[%c6, %c0_42, %c0_43] : memref<13x256x256xbf16, #tpu.memory_space<vmem>>, vector<1x256x128xbf16>
    %61 = vector.shape_cast %60 : vector<1x256x128xbf16> to vector<256x128xbf16>
    %cst_44 = arith.constant dense<0.000000e+00> : vector<32x128xf32>
    %62 = tpu.matmul %59, %61, %cst_44 {dimension_numbers = #tpu.dot_dimension_numbers<[1], [0], [0], [1], [0, 0, 1, 1], [], []>} : vector<32x256xbf16>, vector<256x128xbf16>, vector<32x128xf32> -> vector<32x128xf32>
    %c6_45 = arith.constant 6 : index
    %c0_46 = arith.constant 0 : index
    %c0_47 = arith.constant 0 : index
    %63 = vector.load %arg3[%c6_45, %c0_46, %c0_47] : memref<13x1x256xf32, #tpu.memory_space<vmem>>, vector<1x1x128xf32>
    %64 = vector.shape_cast %63 : vector<1x1x128xf32> to vector<1x128xf32>
    %65 = vector.broadcast %64 : vector<1x128xf32> to vector<32x128xf32>
    %66 = arith.addf %62, %65 : vector<32x128xf32>
    %cst_48 = arith.constant 0.000000e+00 : f32
    %67 = vector.broadcast %cst_48 : f32 to vector<32x128xf32>
    %68 = arith.maximumf %66, %67 : vector<32x128xf32>
    %69 = arith.truncf %68 : vector<32x128xf32> to vector<32x128xbf16>
    %c7 = arith.constant 7 : index
    %c0_49 = arith.constant 0 : index
    %c0_50 = arith.constant 0 : index
    %70 = vector.load %arg2[%c7, %c0_49, %c0_50] : memref<13x256x256xbf16, #tpu.memory_space<vmem>>, vector<1x128x128xbf16>
    %71 = vector.shape_cast %70 : vector<1x128x128xbf16> to vector<128x128xbf16>
    %cst_51 = arith.constant dense<0.000000e+00> : vector<32x128xf32>
    %72 = tpu.matmul %69, %71, %cst_51 {dimension_numbers = #tpu.dot_dimension_numbers<[1], [0], [0], [1], [0, 0, 1, 1], [], []>} : vector<32x128xbf16>, vector<128x128xbf16>, vector<32x128xf32> -> vector<32x128xf32>
    %c7_52 = arith.constant 7 : index
    %c0_53 = arith.constant 0 : index
    %c0_54 = arith.constant 0 : index
    %73 = vector.load %arg3[%c7_52, %c0_53, %c0_54] : memref<13x1x256xf32, #tpu.memory_space<vmem>>, vector<1x1x128xf32>
    %74 = vector.shape_cast %73 : vector<1x1x128xf32> to vector<1x128xf32>
    %75 = vector.broadcast %74 : vector<1x128xf32> to vector<32x128xf32>
    %76 = arith.addf %72, %75 : vector<32x128xf32>
    %cst_55 = arith.constant 0.000000e+00 : f32
    %77 = vector.broadcast %cst_55 : f32 to vector<32x128xf32>
    %78 = arith.maximumf %76, %77 : vector<32x128xf32>
    %79 = arith.truncf %78 : vector<32x128xf32> to vector<32x128xbf16>
    %c8 = arith.constant 8 : index
    %c0_56 = arith.constant 0 : index
    %c0_57 = arith.constant 0 : index
    %80 = vector.load %arg2[%c8, %c0_56, %c0_57] : memref<13x256x256xbf16, #tpu.memory_space<vmem>>, vector<1x128x128xbf16>
    %81 = vector.shape_cast %80 : vector<1x128x128xbf16> to vector<128x128xbf16>
    %cst_58 = arith.constant dense<0.000000e+00> : vector<32x128xf32>
    %82 = tpu.matmul %79, %81, %cst_58 {dimension_numbers = #tpu.dot_dimension_numbers<[1], [0], [0], [1], [0, 0, 1, 1], [], []>} : vector<32x128xbf16>, vector<128x128xbf16>, vector<32x128xf32> -> vector<32x128xf32>
    %c8_59 = arith.constant 8 : index
    %c0_60 = arith.constant 0 : index
    %c0_61 = arith.constant 0 : index
    %83 = vector.load %arg3[%c8_59, %c0_60, %c0_61] : memref<13x1x256xf32, #tpu.memory_space<vmem>>, vector<1x1x128xf32>
    %84 = vector.shape_cast %83 : vector<1x1x128xf32> to vector<1x128xf32>
    %85 = vector.broadcast %84 : vector<1x128xf32> to vector<32x128xf32>
    %86 = arith.addf %82, %85 : vector<32x128xf32>
    %87 = arith.addf %58, %86 : vector<32x128xf32>
    %88 = arith.truncf %87 : vector<32x128xf32> to vector<32x128xbf16>
    %c9 = arith.constant 9 : index
    %c0_62 = arith.constant 0 : index
    %c0_63 = arith.constant 0 : index
    %89 = vector.load %arg2[%c9, %c0_62, %c0_63] : memref<13x256x256xbf16, #tpu.memory_space<vmem>>, vector<1x128x128xbf16>
    %90 = vector.shape_cast %89 : vector<1x128x128xbf16> to vector<128x128xbf16>
    %cst_64 = arith.constant dense<0.000000e+00> : vector<32x128xf32>
    %91 = tpu.matmul %88, %90, %cst_64 {dimension_numbers = #tpu.dot_dimension_numbers<[1], [0], [0], [1], [0, 0, 1, 1], [], []>} : vector<32x128xbf16>, vector<128x128xbf16>, vector<32x128xf32> -> vector<32x128xf32>
    %c9_65 = arith.constant 9 : index
    %c0_66 = arith.constant 0 : index
    %c0_67 = arith.constant 0 : index
    %92 = vector.load %arg3[%c9_65, %c0_66, %c0_67] : memref<13x1x256xf32, #tpu.memory_space<vmem>>, vector<1x1x128xf32>
    %93 = vector.shape_cast %92 : vector<1x1x128xf32> to vector<1x128xf32>
    %94 = vector.broadcast %93 : vector<1x128xf32> to vector<32x128xf32>
    %95 = arith.addf %91, %94 : vector<32x128xf32>
    %cst_68 = arith.constant 0.000000e+00 : f32
    %96 = vector.broadcast %cst_68 : f32 to vector<32x128xf32>
    %97 = arith.maximumf %95, %96 : vector<32x128xf32>
    %98 = arith.truncf %97 : vector<32x128xf32> to vector<32x128xbf16>
    %c10 = arith.constant 10 : index
    %c0_69 = arith.constant 0 : index
    %c0_70 = arith.constant 0 : index
    %99 = vector.load %arg2[%c10, %c0_69, %c0_70] : memref<13x256x256xbf16, #tpu.memory_space<vmem>>, vector<1x128x128xbf16>
    %100 = vector.shape_cast %99 : vector<1x128x128xbf16> to vector<128x128xbf16>
    %cst_71 = arith.constant dense<0.000000e+00> : vector<32x128xf32>
    %101 = tpu.matmul %98, %100, %cst_71 {dimension_numbers = #tpu.dot_dimension_numbers<[1], [0], [0], [1], [0, 0, 1, 1], [], []>} : vector<32x128xbf16>, vector<128x128xbf16>, vector<32x128xf32> -> vector<32x128xf32>
    %c10_72 = arith.constant 10 : index
    %c0_73 = arith.constant 0 : index
    %c0_74 = arith.constant 0 : index
    %102 = vector.load %arg3[%c10_72, %c0_73, %c0_74] : memref<13x1x256xf32, #tpu.memory_space<vmem>>, vector<1x1x128xf32>
    %103 = vector.shape_cast %102 : vector<1x1x128xf32> to vector<1x128xf32>
    %104 = vector.broadcast %103 : vector<1x128xf32> to vector<32x128xf32>
    %105 = arith.addf %101, %104 : vector<32x128xf32>
    %cst_75 = arith.constant 0.000000e+00 : f32
    %106 = vector.broadcast %cst_75 : f32 to vector<32x128xf32>
    %107 = arith.maximumf %105, %106 : vector<32x128xf32>
    %108 = arith.addf %107, %97 : vector<32x128xf32>
    %109 = arith.truncf %108 : vector<32x128xf32> to vector<32x128xbf16>
    %c11 = arith.constant 11 : index
    %c0_76 = arith.constant 0 : index
    %c0_77 = arith.constant 0 : index
    %110 = vector.load %arg2[%c11, %c0_76, %c0_77] : memref<13x256x256xbf16, #tpu.memory_space<vmem>>, vector<1x128x128xbf16>
    %111 = vector.shape_cast %110 : vector<1x128x128xbf16> to vector<128x128xbf16>
    %cst_78 = arith.constant dense<0.000000e+00> : vector<32x128xf32>
    %112 = tpu.matmul %109, %111, %cst_78 {dimension_numbers = #tpu.dot_dimension_numbers<[1], [0], [0], [1], [0, 0, 1, 1], [], []>} : vector<32x128xbf16>, vector<128x128xbf16>, vector<32x128xf32> -> vector<32x128xf32>
    %c11_79 = arith.constant 11 : index
    %c0_80 = arith.constant 0 : index
    %c0_81 = arith.constant 0 : index
    %113 = vector.load %arg3[%c11_79, %c0_80, %c0_81] : memref<13x1x256xf32, #tpu.memory_space<vmem>>, vector<1x1x128xf32>
    %114 = vector.shape_cast %113 : vector<1x1x128xf32> to vector<1x128xf32>
    %115 = vector.broadcast %114 : vector<1x128xf32> to vector<32x128xf32>
    %116 = arith.addf %112, %115 : vector<32x128xf32>
    %cst_82 = arith.constant 0.000000e+00 : f32
    %117 = vector.broadcast %cst_82 : f32 to vector<32x128xf32>
    %118 = arith.maximumf %116, %117 : vector<32x128xf32>
    %119 = arith.addf %118, %87 : vector<32x128xf32>
    %120 = arith.truncf %119 : vector<32x128xf32> to vector<32x128xbf16>
    %c12 = arith.constant 12 : index
    %c0_83 = arith.constant 0 : index
    %c0_84 = arith.constant 0 : index
    %121 = vector.load %arg2[%c12, %c0_83, %c0_84] : memref<13x256x256xbf16, #tpu.memory_space<vmem>>, vector<1x128x128xbf16>
    %122 = vector.shape_cast %121 : vector<1x128x128xbf16> to vector<128x128xbf16>
    %cst_85 = arith.constant dense<0.000000e+00> : vector<32x128xf32>
    %123 = tpu.matmul %120, %122, %cst_85 {dimension_numbers = #tpu.dot_dimension_numbers<[1], [0], [0], [1], [0, 0, 1, 1], [], []>} : vector<32x128xbf16>, vector<128x128xbf16>, vector<32x128xf32> -> vector<32x128xf32>
    %c12_86 = arith.constant 12 : index
    %c0_87 = arith.constant 0 : index
    %c0_88 = arith.constant 0 : index
    %124 = vector.load %arg3[%c12_86, %c0_87, %c0_88] : memref<13x1x256xf32, #tpu.memory_space<vmem>>, vector<1x1x128xf32>
    %125 = vector.shape_cast %124 : vector<1x1x128xf32> to vector<1x128xf32>
    %126 = vector.broadcast %125 : vector<1x128xf32> to vector<32x128xf32>
    %127 = arith.addf %123, %126 : vector<32x128xf32>
    %c0_89 = arith.constant 0 : index
    %c0_90 = arith.constant 0 : index
    %128 = vector.load %arg4[%c0_89, %c0_90] : memref<32x128xf32, #tpu.memory_space<vmem>>, vector<32x128xf32>
    tpu.vector_store %arg4[%c0_89, %c0_90], %127 {strides = array<i32>} : memref<32x128xf32, #tpu.memory_space<vmem>>, vector<32x128xf32>,
    return
  }
  func.func @transform_0(%arg0: i32) -> (i32, i32) {
    %c0_i32 = arith.constant 0 : i32
    %c0_i32_0 = arith.constant 0 : i32
    return %arg0, %c0_i32 : i32, i32
  }
  func.func @transform_1(%arg0: i32) -> (i32, i32, i32) {
    %c0_i32 = arith.constant 0 : i32
    %c0_i32_0 = arith.constant 0 : i32
    %c0_i32_1 = arith.constant 0 : i32
    %c0_i32_2 = arith.constant 0 : i32
    return %c0_i32, %c0_i32_0, %c0_i32_1 : i32, i32, i32
  }
  func.func @transform_2(%arg0: i32) -> (i32, i32, i32) {
    %c0_i32 = arith.constant 0 : i32
    %c0_i32_0 = arith.constant 0 : i32
    %c0_i32_1 = arith.constant 0 : i32
    %c0_i32_2 = arith.constant 0 : i32
    return %c0_i32, %c0_i32_0, %c0_i32_1 : i32, i32, i32
  }
  func.func @transform_3(%arg0: i32) -> (i32, i32) {
    %c0_i32 = arith.constant 0 : i32
    %c0_i32_0 = arith.constant 0 : i32
    return %arg0, %c0_i32 : i32, i32
  }
}

</mosaic_0001>

<bundles_post_ra>
// kernel: tpu_custom_call.1
= control target key start
LH: loop header
LB: loop body
LE: loop exit
PB: predicated region body
PF: predicated region fallthrough
CT: control target
= control target key end

     0   :  { %8 = vsyncpa [#allocation3], 0  ;;  %s3614_s0 = inlined_call_operand.hbm [shape: bf16[64,128], index: 0, kind: input, shape index: {}]   ;;  %s3615_s1 = inlined_call_operand.hbm [shape: bf16[13,256,256], index: 1, kind: input, shape index: {}]   ;;  %s3616_s2 = inlined_call_operand.hbm [shape: f32[13,1,256], index: 2, kind: input, shape index: {}]   ;;  %s3617_s3 = inlined_call_operand.hbm [shape: f32[64,128], index: 3, kind: output, shape index: {}]  }
   0x1   :  { %10 = vsyncpa [#allocation3 + $0x1], 0 }
   0x2   :  { %11 = vsyncpa [#allocation6], 0 }
   0x3   :  { %12 = vsyncpa [#allocation4], 0 }
   0x4   :  { %14 = vsyncpa [#allocation4 + $0x1], 0  ;;  %s3331_s12 = smov 0   ;;  %s3333_s13 = smov 0  }
   0x5   :  { %s3335_s14 = smov 0   ;;  %s3337_s15 = smov 0  }
   0x6 LB: > { %s3352_s16 = sadd.s32 4294967295, %s3296_s15   ;;  %s2370_s17 = sadd.s32 4294967294, %s3296_s15   ;;  %s3296_s15 = sphi %s3337_s15, %s3637_s15   ;;  %s3292_s14 = sphi %s3335_s14, %s3636_s14   ;;  %s3288_s13 = sphi %s3333_s13, %s3635_s13   ;;  %s3284_s12 = sphi %s3331_s12, %s3634_s12  }
   0x7   : > { %p40_p0 = scmp.ne.s32.totalorder %s3288_s13, %s3284_s12  ;;  %p3618_p1 = scmp.eq.s32.totalorder %s3352_s16, 0 }
   0x8   : > { %p112_p3 = scmp.eq.s32.totalorder %s2370_s17, 1  ;;  %p2371_p5 = scmp.ge.s32.totalorder %s3296_s15, 1 }
   0x9   : > { %p3361_p4 = por %p3618_p1, %p40_p0  ;;  %p119_p7 = scmp.lt.s32.totalorder %s3296_s15, 3 }
   0xa   : > { %p3366_p6 = por %p112_p3, %p40_p0  ;;  %s3298_s21 = smov [#allocation5]  }
   0xb   : > { %s3621_s18 = scalar_select %p3361_p4, 1, 0 }
   0xc   : > { %s3622_s19 = scalar_select %p3366_p6, 1, 0 }
   0xd   : > { %p3371_p8 = pnand %p2371_p5, %p119_p7  ;;  %s131_s22 = sshll.u32 %s3298_s21, 4  ;;  %s3375_s22 = int_to_ptr.vmem [resolvable:$true] %s131_s22 }
   0xe   : > { %s3299_s24 = smov [#allocation7]   ;;  %s3140_s28 = scalar_lea.hbm %s3615_s1, 53248 }
   0xf   : > { %p2882_p9 = pneg %p3371_p8  ;;  %s144_s25 = sshll.u32 %s3299_s24, 4  ;;  %s3386_s25 = int_to_ptr.vmem [resolvable:$true] %s144_s25 }
  0x10   : > { %p3141_p12 = scmp.ne.s32.totalorder %s3615_s1, %s3140_s28  ;;  %p3147_p5 = scmp.lt.u32.totalorder %s3140_s28, %s3615_s1 }
  0x11   : > { %p3382_p11 = pnand %p2882_p9, %p3618_p1 }
  0x13   : > { %p3142_p13 = pneg %p3382_p11 }
  0x15   : > { %p3143_p0 = pnand %p3142_p13, %p3141_p12 }
  0x17   : > { %p3144_p3 = pneg %p3143_p0 }
  0x19   : > { %p3149_p7 = pnand %p3147_p5, %p3144_p3 }
  0x1b   : > { %3152 = shalt.err (!%p3149_p7)
}
  0x1c   : > { %s3153_s6 = scalar_lea.vmem %s3375_s22, 53248  ;;  %p3161_p2 = scmp.lt.s32.totalorder %s3375_s22, %s3375_s22 }
  0x1d   : > { %p3154_p9 = scmp.ne.s32.totalorder %s3375_s22, %s3153_s6  ;;  %p3162_p12 = scmp.lt.s32.totalorder %s3153_s6, %s3153_s6 }
  0x1f   : > { %p3156_p10 = pnand %p3154_p9, %p3142_p13  ;;  %p3163_p0 = por %p3162_p12, %p3161_p2 }
  0x21   : > { %p3157_p1 = pneg %p3156_p10 }
  0x23   : > { %p3164_p6 = pnand %p3163_p0, %p3157_p1 }
  0x25   : > { %3167 = shalt.err (!%p3164_p6)
}
  0x26   : > { %s3300_s7 = smov 128   ;;  %s3301_s8 = smov 8  }
  0x27   : > { %2885 = dma.hbm_to_vmem [thread:$0]  (!%p3382_p11), %s3615_s1, 53248, %s3375_s22, [#allocation6], %s3300_s7, %s3300_s7, %s3301_s8  }
  0x28   : > { %s3168_s21 = scalar_lea.hbm %s3616_s2, 416 }
  0x29   : > { %p3169_p2 = scmp.ne.s32.totalorder %s3616_s2, %s3168_s21  ;;  %p3175_p10 = scmp.lt.u32.totalorder %s3168_s21, %s3616_s2 }
  0x2b   : > { %p3171_p1 = pnand %p3169_p2, %p3142_p13 }
  0x2d   : > { %p3172_p6 = pneg %p3171_p1 }
  0x2f   : > { %p3177_p3 = pnand %p3175_p10, %p3172_p6 }
  0x31   : > { %3180 = shalt.err (!%p3177_p3)
}
  0x32   : > { %s3181_s22 = scalar_lea.vmem %s3386_s25, 416  ;;  %p3189_p12 = scmp.lt.s32.totalorder %s3386_s25, %s3386_s25 }
  0x33   : > { %p3182_p5 = scmp.ne.s32.totalorder %s3386_s25, %s3181_s22  ;;  %p3190_p0 = scmp.lt.s32.totalorder %s3181_s22, %s3181_s22 }
  0x35   : > { %p3184_p7 = pnand %p3182_p5, %p3142_p13  ;;  %p3191_p2 = por %p3190_p0, %p3189_p12 }
  0x37   : > { %p3185_p9 = pneg %p3184_p7 }
  0x39   : > { %p3192_p1 = pnand %p3191_p2, %p3185_p9 }
  0x3b   : > { %3195 = shalt.err (!%p3192_p1)
}
  0x3c   : > { %s3302_s29 = smov 32   ;;  %s3303_s30 = smov 2  }
  0x3d   : > { %2888 = dma.hbm_to_vmem [thread:$0]  (!%p3382_p11), %s3616_s2, 416, %s3386_s25, [#allocation6], %s3302_s29, %s3302_s29, %s3303_s30  }
  0x3e   : > { %s3441_s6 = sadd.s32 1, %s3296_s15   ;;  %s27_s8 = sadd.s32 1, %s3292_s14 }
  0x3f   : > { %s24_s7 = ssub.s32 %s3296_s15, %s3441_s6  ;;  %p34_p6 = scmp.ne.s32.totalorder %s3292_s14, %s3288_s13 }
  0x40   : > { %p25_p13 = scmp.eq.s32.totalorder %s24_s7, 0  ;;  %p35_p10 = scmp.eq.s32.totalorder %s3296_s15, 0 }
  0x41   : > { %p3625_p5 = scmp.eq.s32.totalorder %s3352_s16, 1  ;;  %p2899_p9 = scmp.lt.s32.totalorder %s3296_s15, 2 }
  0x42   : > { %s3450_s9 = scalar_select %p25_p13, %s3292_s14, %s27_s8  }
  0x43   : > { %p36_p3 = por %p35_p10, %p34_p6  ;;  %p3454_p7 = por %p3625_p5, %p34_p6 }
  0x44   : > { %s158_s23 = sand.u32 1, %s3292_s14   ;;  %s2560_s25 = sshll.u32 %s3296_s15, 8 }
  0x45   : > { %s3626_s10 = scalar_select %p3454_p7, 1, 0 }
  0x46   : > { %s2375_s11 = sshll.u32 %s158_s23, 4  ;;  %s3464_s24 = scalar_lea.hbm %s3614_s0, %s2560_s25 }
  0x47   : > { %s162_s26 = scalar_lea.vmem [#allocation2], %s2375_s11  ;;  %p3468_p11 = pnand %p2899_p9, %p36_p3 }
  0x48   : > { %s169_s27 = sshll.u32 %s162_s26, 4  ;;  %s3472_s22 = scalar_lea.sflag [#allocation3], %s158_s23  ;;  %s3466_s27 = int_to_ptr.vmem [resolvable:$true] %s169_s27 }
  0x49   : > { %s3196_s29 = scalar_lea.hbm %s3464_s24, 256  ;;  %p3198_p0 = pneg %p3468_p11 }
  0x4a   : > { %p3197_p12 = scmp.ne.s32.totalorder %s3464_s24, %s3196_s29  ;;  %s3201_s5 = scalar_lea.hbm %s3614_s0, 512 }
  0x4b   : > { %p3202_p13 = scmp.lt.u32.totalorder %s3464_s24, %s3614_s0  ;;  %p3203_p6 = scmp.lt.u32.totalorder %s3201_s5, %s3196_s29 }
  0x4c   : > { %p3199_p2 = pnand %p3198_p0, %p3197_p12  ;;  %p3205_p3 = scmp.lt.u32.totalorder %s3196_s29, %s3464_s24 }
  0x4d   : > { %p3204_p10 = por %p3203_p6, %p3202_p13 }
  0x4e   : > { %p3200_p1 = pneg %p3199_p2 }
  0x4f   : > { %p3206_p5 = por %p3205_p3, %p3204_p10 }
  0x51   : > { %p3207_p9 = pnand %p3206_p5, %p3200_p1 }
  0x53   : > { %3210 = shalt.err (!%p3207_p9)
}
  0x54   : > { %s3211_s23 = scalar_lea.vmem %s3466_s27, 256  ;;  %s3304_s11 = smov [#allocation2]  }
  0x55   : > { %p3212_p12 = scmp.ne.s32.totalorder %s3466_s27, %s3211_s23  ;;  %s3216_s25 = sshll.u32 %s3304_s11, 4  ;;  %s3217_s25 = int_to_ptr.vmem [resolvable:$false] %s3216_s25 }
  0x56   : > { %s3218_s17 = scalar_lea.vmem %s3217_s25, 512  ;;  %p3219_p4 = scmp.lt.s32.totalorder %s3466_s27, %s3217_s25 }
  0x57   : > { %p3214_p2 = pnand %p3212_p12, %p3198_p0  ;;  %p3220_p13 = scmp.lt.s32.totalorder %s3218_s17, %s3211_s23 }
  0x59   : > { %p3215_p7 = pneg %p3214_p2  ;;  %p3221_p6 = por %p3220_p13, %p3219_p4 }
  0x5b   : > { %p3222_p10 = pnand %p3221_p6, %p3215_p7 }
  0x5d   : > { %3225 = shalt.err (!%p3222_p10)
}
  0x5e   : > { %s3305_s21 = smov 64   ;;  %s3306_s26 = smov 4  }
  0x5f   : > { %2892 = dma.hbm_to_vmem [thread:$0]  (!%p3468_p11), %s3464_s24, 256, %s3466_s27, %s3472_s22, %s3305_s21, %s3305_s21, %s3306_s26  }
  0x60   : > { %181 = sbr.rel (%p3371_p8) target bundleno = 2643 (0xa53), region = 32  ;;  %s3503_s29 = sand.u32 (!%p3371_p8), 1, %s3288_s13  }
  0x61   : > { %s2379_s30 = sshll.u32 (!%p3371_p8), %s3503_s29, 4  ;;  %s184_s4 = scalar_lea.sflag (!%p3371_p8), [#allocation3], %s3503_s29 }
  0x62   : > { %s3507_s5 = scalar_lea.vmem (!%p3371_p8), [#allocation2], %s2379_s30  ;;  %p3628_p4 = scmp.ne.s32.totalorder (!%p3371_p8), %s3621_s18, 0 }
  0x67   : > { %3271 = dma.done.wait (%p3628_p4), %s184_s4, 256  }
  0x68   : > { %3273 = vsyncadd (%p3628_p4), %s184_s4, 4294967040  ;;  %p3629_p7 = scmp.eq.s32.totalorder %s3352_s16, 0 }
  0x6a   : > { %3275 = dma.done.wait (%p3629_p7), [#allocation6], 53664   ;;  %p3630_p8 = pmov %p3629_p7 }
  0x6b   : > { %v3307_v0 = vmov 0   ;;  %v2946_v1 = vld [vmem:[#allocation5 + $0x4] ss:$8 sps:$4 sm:$0xff]   ;;  %v2948_v2 = vld [vmem:[#allocation5] ss:$8 sps:$4 sm:$0xff]   ;;  %v243_v63 = vlaneseq  ;;  %s2382_s18 = sshll.u32 %s3503_s29, 5 }
  0x6c   : > { %3277 = vsyncadd (%p3630_p8), [#allocation6], 4294913632  ;;  %377 = vmatprep.mubr.bf16.mxu0 %v3307_v0  ;;  %550 = vmatprep.mubr.bf16.mxu1 %v3307_v0  ;;  %v2949_v3 = vld [vmem:[#allocation5 + $0x14] ss:$8 sps:$4 sm:$0xff]   ;;  %v2951_v4 = vld [vmem:[#allocation5 + $0x10] ss:$8 sps:$4 sm:$0xff]  }
  0x6d   : > { %345 = vmatprep.subr.bf16.mxu0 %v2946_v1  ;;  %v2952_v5 = vld [vmem:[#allocation5 + $0x24] ss:$8 sps:$4 sm:$0xff]   ;;  %v2954_v6 = vld [vmem:[#allocation5 + $0x20] ss:$8 sps:$4 sm:$0xff]   ;;  %v2955_v7 = vld [vmem:[#allocation5 + $0x34] ss:$8 sps:$4 sm:$0xff]  }
  0x6e   : > { %346 = vmatpush1.bf16.msra.mxu0 %v2948_v2  ;;  %v2957_v8 = vld [vmem:[#allocation5 + $0x30] ss:$8 sps:$4 sm:$0xff]   ;;  %v2958_v9 = vld [vmem:[#allocation5 + $0x44] ss:$8 sps:$4 sm:$0xff]   ;;  %v2974_v11 = vld [vmem:[#allocation5 + $0x100] ss:$8 sps:$4 sm:$0xff]  }
  0x6f   : > { %347 = vmatprep.subr.bf16.mxu0 %v2949_v3  ;;  %v2972_v10 = vld [vmem:[#allocation5 + $0x104] ss:$8 sps:$4 sm:$0xff]   ;;  %v2975_v12 = vld [vmem:[#allocation5 + $0x114] ss:$8 sps:$4 sm:$0xff]   ;;  %v2960_v13 = vld [vmem:[#allocation5 + $0x40] ss:$8 sps:$4 sm:$0xff]  }
  0x70   : > { %518 = vmatprep.subr.bf16.mxu1 %v2972_v10  ;;  %v2961_v14 = vld [vmem:[#allocation5 + $0x54] ss:$8 sps:$4 sm:$0xff]   ;;  %v2977_v15 = vld [vmem:[#allocation5 + $0x110] ss:$8 sps:$4 sm:$0xff]   ;;  %v2978_v16 = vld [vmem:[#allocation5 + $0x124] ss:$8 sps:$4 sm:$0xff]  }
  0x71   : > { %519 = vmatpush1.bf16.msra.mxu1 %v2974_v11  ;;  %v2963_v17 = vld [vmem:[#allocation5 + $0x50] ss:$8 sps:$4 sm:$0xff]   ;;  %v2964_v18 = vld [vmem:[#allocation5 + $0x64] ss:$8 sps:$4 sm:$0xff]   ;;  %v2980_v19 = vld [vmem:[#allocation5 + $0x120] ss:$8 sps:$4 sm:$0xff]  }
  0x72   : > { %348 = vmatpush1.bf16.msra.mxu0 %v2951_v4  ;;  %520 = vmatprep.subr.bf16.mxu1 %v2975_v12  ;;  %v2981_v20 = vld [vmem:[#allocation5 + $0x134] ss:$8 sps:$4 sm:$0xff]   ;;  %v2966_v21 = vld [vmem:[#allocation5 + $0x60] ss:$8 sps:$4 sm:$0xff]   ;;  %v2983_v23 = vld [vmem:[#allocation5 + $0x130] ss:$8 sps:$4 sm:$0xff]  }
  0x73   : > { %349 = vmatprep.subr.bf16.mxu0 %v2952_v5  ;;  %v2967_v22 = vld [vmem:[#allocation5 + $0x74] ss:$8 sps:$4 sm:$0xff]   ;;  %v2984_v24 = vld [vmem:[#allocation5 + $0x144] ss:$8 sps:$4 sm:$0xff]   ;;  %v2969_v25 = vld [vmem:[#allocation5 + $0x70] ss:$8 sps:$4 sm:$0xff]  }
  0x74   : > { %v2986_v26 = vld [vmem:[#allocation5 + $0x140] ss:$8 sps:$4 sm:$0xff]   ;;  %v2987_v27 = vld [vmem:[#allocation5 + $0x154] ss:$8 sps:$4 sm:$0xff]   ;;  %v2989_v29 = vld [vmem:[#allocation5 + $0x150] ss:$8 sps:$4 sm:$0xff]  }
  0x75   : > { %521 = vmatpush1.bf16.msra.mxu1 %v2977_v15  ;;  %v2970_v28 = vld [vmem:[%s3507_s5] sm:$0xff]   ;;  %v2971_v30 = vld [vmem:[%s3507_s5 + $0x8] sm:$0xff]   ;;  %v244_v1 = vshrl.u32 %v243_v63, 7  ;;  %s217_s20 = scalar_lea.vmem [#allocation8], %s2382_s18  ;;  %s2561_s27 = sshll.u32 %s3352_s16, 9 }
  0x76   : > { %350 = vmatpush1.bf16.msra.mxu0 %v2954_v6  ;;  %522 = vmatprep.subr.bf16.mxu1 %v2978_v16  ;;  %v2990_v31 = vld [vmem:[#allocation5 + $0x164] ss:$8 sps:$4 sm:$0xff]   ;;  %v2992_v32 = vld [vmem:[#allocation5 + $0x160] ss:$8 sps:$4 sm:$0xff]   ;;  %v2993_v33 = vld [vmem:[#allocation5 + $0x174] ss:$8 sps:$4 sm:$0xff]   ;;  %s3570_s7 = scalar_lea.hbm %s3617_s3, %s2561_s27 }
  0x77   : > { %351 = vmatprep.subr.bf16.mxu0 %v2955_v7  ;;  %v2995_v34 = vld [vmem:[#allocation5 + $0x170] ss:$8 sps:$4 sm:$0xff]   ;;  %v2996_v35 = vld [vmem:[#allocation5 + $0x200] ss:$8 sps:$4 sm:$0xff]   ;;  %v2998_v36 = vld [vmem:[#allocation5 + $0x204] ss:$8 sps:$4 sm:$0xff]  }
  0x78   : > { %v3001_v37 = vld [vmem:[#allocation5 + $0x214] ss:$8 sps:$4 sm:$0xff]   ;;  %v2999_v38 = vld [vmem:[#allocation5 + $0x210] ss:$8 sps:$4 sm:$0xff]   ;;  %v3004_v39 = vld [vmem:[#allocation5 + $0x224] ss:$8 sps:$4 sm:$0xff]  }
  0x79   : > { %523 = vmatpush1.bf16.msra.mxu1 %v2980_v19  ;;  %v3002_v40 = vld [vmem:[#allocation5 + $0x220] ss:$8 sps:$4 sm:$0xff]   ;;  %v3007_v41 = vld [vmem:[#allocation5 + $0x234] ss:$8 sps:$4 sm:$0xff]   ;;  %v3005_v42 = vld [vmem:[#allocation5 + $0x230] ss:$8 sps:$4 sm:$0xff]  }
  0x7a   : > { %352 = vmatpush1.bf16.msra.mxu0 %v2957_v8  ;;  %524 = vmatprep.subr.bf16.mxu1 %v2981_v20  ;;  %v3010_v43 = vld [vmem:[#allocation5 + $0x244] ss:$8 sps:$4 sm:$0xff]   ;;  %v3008_v44 = vld [vmem:[#allocation5 + $0x240] ss:$8 sps:$4 sm:$0xff]   ;;  %v3013_v45 = vld [vmem:[#allocation5 + $0x254] ss:$8 sps:$4 sm:$0xff]  }
  0x7b   : > { %353 = vmatprep.subr.bf16.mxu0 %v2958_v9  ;;  %v3011_v46 = vld [vmem:[#allocation5 + $0x250] ss:$8 sps:$4 sm:$0xff]   ;;  %v3016_v47 = vld [vmem:[#allocation5 + $0x264] ss:$8 sps:$4 sm:$0xff]   ;;  %v3014_v48 = vld [vmem:[#allocation5 + $0x260] ss:$8 sps:$4 sm:$0xff]  }
  0x7c   : > { %v3019_v49 = vld [vmem:[#allocation5 + $0x274] ss:$8 sps:$4 sm:$0xff]   ;;  %v3017_v50 = vld [vmem:[#allocation5 + $0x270] ss:$8 sps:$4 sm:$0xff]   ;;  %v3022_v51 = vld [vmem:[#allocation5 + $0x284] ss:$8 sps:$4 sm:$0xff]  }
  0x7d   : > { %525 = vmatpush1.bf16.msra.mxu1 %v2983_v23  ;;  %v3020_v52 = vld [vmem:[#allocation5 + $0x280] ss:$8 sps:$4 sm:$0xff]   ;;  %v3025_v53 = vld [vmem:[#allocation5 + $0x294] ss:$8 sps:$4 sm:$0xff]   ;;  %v3023_v54 = vld [vmem:[#allocation5 + $0x290] ss:$8 sps:$4 sm:$0xff]  }
  0x7e   : > { %354 = vmatpush1.bf16.msra.mxu0 %v2960_v13  ;;  %526 = vmatprep.subr.bf16.mxu1 %v2984_v24  ;;  %v3028_v55 = vld [vmem:[#allocation5 + $0x2a4] ss:$8 sps:$4 sm:$0xff]   ;;  %v3026_v56 = vld [vmem:[#allocation5 + $0x2a0] ss:$8 sps:$4 sm:$0xff]   ;;  %v3031_v57 = vld [vmem:[#allocation5 + $0x2b4] ss:$8 sps:$4 sm:$0xff]  }
  0x7f   : > { %355 = vmatprep.subr.bf16.mxu0 %v2961_v14  ;;  %v3029_v58 = vld [vmem:[#allocation5 + $0x2b0] ss:$8 sps:$4 sm:$0xff]   ;;  %v3034_v59 = vld [vmem:[#allocation5 + $0x2c4] ss:$8 sps:$4 sm:$0xff]   ;;  %v3032_v60 = vld [vmem:[#allocation5 + $0x2c0] ss:$8 sps:$4 sm:$0xff]  }
  0x80   : > { %v3037_v61 = vld [vmem:[#allocation5 + $0x2d4] ss:$8 sps:$4 sm:$0xff]   ;;  %v3035_v62 = vld [vmem:[#allocation5 + $0x2d0] ss:$8 sps:$4 sm:$0xff]   ;;  %v3522_v2 = vsub.s32 0, %v244_v1  ;;  %v3524_v4 = vsub.s32 1, %v244_v1 }
  0x81   : > { %527 = vmatpush1.bf16.msra.mxu1 %v2986_v26  ;;  %v241_v3 = vld [vmem:[#allocation7] sm:$0x3]  ;;  %s2278_s24 = sshll.u32 %s217_s20, 4  ;;  %s2265_s16 = scalar_lea.sflag [#allocation4], %s3503_s29  ;;  %s3565_s24 = int_to_ptr.vmem [resolvable:$true] %s2278_s24 }
  0x82   : > { %356 = vmatpush1.bf16.msra.mxu0 %v2963_v17  ;;  %528 = vmatprep.subr.bf16.mxu1 %v2987_v27  ;;  %v246_v5 = vrot.slane %v241_v3, %v3522_v2  ;;  %v250_v6 = vrot.slane %v241_v3, %v3524_v4  ;;  %s3226_s8 = scalar_lea.vmem %s3565_s24, 512  ;;  %p3631_p0 = scmp.ne.s32.totalorder %s3626_s10, 0 }
  0x83   : > { %357 = vmatprep.subr.bf16.mxu0 %v2964_v18  ;;  %p3227_p11 = scmp.ne.s32.totalorder %s3565_s24, %s3226_s8  ;;  %s3308_s23 = smov [#allocation8]  }
  0x84   : > { %s3230_s11 = sshll.u32 %s3308_s23, 4  ;;  %s3231_s11 = int_to_ptr.vmem [resolvable:$false] %s3230_s11 }
  0x85   : > { %529 = vmatpush1.bf16.msra.mxu1 %v2989_v29  ;;  %p3228_p1 = pnand %p3227_p11, %p3631_p0  ;;  %s3232_s25 = scalar_lea.vmem %s3231_s11, 1024 }
  0x86   : > { %358 = vmatpush1.bf16.msra.mxu0 %v2966_v21  ;;  %530 = vmatprep.subr.bf16.mxu1 %v2990_v31  ;;  %p3233_p5 = scmp.lt.s32.totalorder %s3565_s24, %s3231_s11  ;;  %p3234_p9 = scmp.lt.s32.totalorder %s3232_s25, %s3226_s8 }
  0x87   : > { %359 = vmatprep.subr.bf16.mxu0 %v2967_v22  ;;  %p3229_p3 = pneg %p3228_p1 }
  0x88   : > { %p3235_p12 = por %p3234_p9, %p3233_p5 }
  0x89   : > { %531 = vmatpush1.bf16.msra.mxu1 %v2992_v32 }
  0x8a   : > { %360 = vmatpush1.bf16.msra.mxu0 %v2969_v25  ;;  %532 = vmatprep.subr.bf16.mxu1 %v2993_v33  ;;  %p3236_p2 = pnand %p3235_p12, %p3229_p3 }
  0x8b   : > { %789 = vmatprep.subr.bf16.mxu0 %v2998_v36  ;;  %v3038_v36 = vld [vmem:[#allocation5 + $0x2e0] ss:$8 sps:$4 sm:$0xff]  }
  0x8d   : > { %378 = vmatmul.mubr.bf16.vlgmr.msra.gmra.mrb[0].mxu0 %v2970_v28  ;;  %533 = vmatpush1.bf16.msra.mxu1 %v2995_v34 }
  0x8e   : > { %387 = vmatprep.mubr.bf16.mxu0 %v3307_v0  ;;  %790 = vmatpush1.bf16.msra.mxu0 %v2996_v35  ;;  %v3040_v35 = vld [vmem:[#allocation5 + $0x2e4] ss:$8 sps:$4 sm:$0xff]  }
  0x8f   : > { %791 = vmatprep.subr.bf16.mxu0 %v3001_v37  ;;  %v3043_v37 = vld [vmem:[#allocation5 + $0x2f4] ss:$8 sps:$4 sm:$0xff]  }
  0x92   : > { %792 = vmatpush1.bf16.msra.mxu0 %v2999_v38  ;;  %v3041_v38 = vld [vmem:[#allocation5 + $0x2f0] ss:$8 sps:$4 sm:$0xff]  }
  0x93   : > { %793 = vmatprep.subr.bf16.mxu0 %v3004_v39  ;;  %v3045_v39 = vld [vmem:[#allocation5 + $0x300] ss:$8 sps:$4 sm:$0xff]  }
  0x95   : > { %388 = vmatmul.mubr.bf16.gmra.mrb[4].mxu0 %v2971_v30 }
  0x96   : > { %794 = vmatpush1.bf16.msra.mxu0 %v3002_v40  ;;  %v3046_v40 = vld [vmem:[#allocation5 + $0x390] ss:$8 sps:$4 sm:$0xff]  }
  0x97   : > { %795 = vmatprep.subr.bf16.mxu0 %v3007_v41  ;;  %v3047_v41 = vld [vmem:[#allocation5 + $0x310] ss:$8 sps:$4 sm:$0xff]  }
  0x9a   : > { %796 = vmatpush1.bf16.msra.mxu0 %v3005_v42  ;;  %v3048_v42 = vld [vmem:[#allocation5 + $0x3a0] ss:$8 sps:$4 sm:$0xff]  }
  0x9b   : > { %797 = vmatprep.subr.bf16.mxu0 %v3010_v43  ;;  %v3049_v43 = vld [vmem:[#allocation5 + $0x320] ss:$8 sps:$4 sm:$0xff]  }
  0x9e   : > { %798 = vmatpush1.bf16.msra.mxu0 %v3008_v44  ;;  %v3050_v44 = vld [vmem:[#allocation5 + $0x3b0] ss:$8 sps:$4 sm:$0xff]  }
  0x9f   : > { %799 = vmatprep.subr.bf16.mxu0 %v3013_v45  ;;  %v3051_v45 = vld [vmem:[#allocation5 + $0x330] ss:$8 sps:$4 sm:$0xff]  }
  0xa2   : > { %800 = vmatpush1.bf16.msra.mxu0 %v3011_v46  ;;  %v3052_v46 = vld [vmem:[#allocation5 + $0x3c0] ss:$8 sps:$4 sm:$0xff]  }
  0xa3   : > { %801 = vmatprep.subr.bf16.mxu0 %v3016_v47  ;;  %v3053_v47 = vld [vmem:[#allocation5 + $0x340] ss:$8 sps:$4 sm:$0xff]  }
  0xa6   : > { %802 = vmatpush1.bf16.msra.mxu0 %v3014_v48  ;;  %v3054_v48 = vld [vmem:[#allocation5 + $0x3d0] ss:$8 sps:$4 sm:$0xff]  }
  0xa7   : > { %803 = vmatprep.subr.bf16.mxu0 %v3019_v49  ;;  %v426_v49 = vld [vmem:[#allocation7 + $0x2] sm:$0x3] }
  0xaa   : > { %804 = vmatpush1.bf16.msra.mxu0 %v3017_v50  ;;  %v431_v50 = vrot.slane %v426_v49, %v3522_v2 }
  0xab   : > { %805 = vmatprep.subr.bf16.mxu0 %v3022_v51  ;;  %v435_v51 = vrot.slane %v426_v49, %v3524_v4 }
  0xae   : > { %806 = vmatpush1.bf16.msra.mxu0 %v3020_v52 }
  0xaf   : > { %807 = vmatprep.subr.bf16.mxu0 %v3025_v53 }
  0xb2   : > { %808 = vmatpush1.bf16.msra.mxu0 %v3023_v54 }
  0xb3   : > { %809 = vmatprep.subr.bf16.mxu0 %v3028_v55 }
  0xb6   : > { %810 = vmatpush1.bf16.msra.mxu0 %v3026_v56 }
  0xb7   : > { %811 = vmatprep.subr.bf16.mxu0 %v3031_v57 }
  0xba   : > { %812 = vmatpush1.bf16.msra.mxu0 %v3029_v58 }
  0xbb   : > { %813 = vmatprep.subr.bf16.mxu0 %v3034_v59 }
  0xbe   : > { %814 = vmatpush1.bf16.msra.mxu0 %v3032_v60 }
  0xbf   : > { %815 = vmatprep.subr.bf16.mxu0 %v3037_v61 }
  0xc2   : > { %816 = vmatpush1.bf16.msra.mxu0 %v3035_v62 }
  0xc3   : > { %817 = vmatprep.subr.bf16.mxu0 %v3040_v35 }
  0xc6   : > { %818 = vmatpush1.bf16.msra.mxu0 %v3038_v36 }
  0xc7   : > { %819 = vmatprep.subr.bf16.mxu0 %v3043_v37 }
  0xca   : > { %820 = vmatpush1.bf16.msra.mxu0 %v3041_v38 }
 0x160   : > { %v379_v7 = vpop.f32.mrb[0].mxu0 }
 0x161   : > { %v380_v8 = vadd.f32 %v379_v7, %v246_v5  ;;  %v381_v9 = vpop.f32.mrb[1].mxu0 }
 0x162   : > { %v382_v10 = vadd.f32 %v381_v9, %v250_v6  ;;  %v383_v11 = vpop.f32.mrb[2].mxu0 }
 0x163   : > { %v384_v12 = vadd.f32 %v383_v11, %v246_v5  ;;  %v385_v13 = vpop.f32.mrb[3].mxu0  ;;  %v398_v15 = vmax.f32 %v380_v8, 0.0 }
 0x164   : > { %v386_v14 = vadd.f32 %v385_v13, %v250_v6  ;;  %v399_v17 = vmax.f32 %v382_v10, 0.0 }
 0x165   : > { %v400_v16 = vmax.f32 %v384_v12, 0.0 }
 0x166   : > { %v401_v18 = vmax.f32 %v386_v14, 0.0 }
 0x167   : > { %v3528_v19 = vpack.c.bf16 %v400_v16, %v398_v15 }
 0x168   : > { %v3530_v20 = vpack.c.bf16 %v401_v18, %v399_v17  ;;  %v389_v21 = vpop.f32.mrb[4].mxu0 }
 0x169   : > { %v390_v22 = vadd.f32 %v389_v21, %v246_v5  ;;  %v391_v23 = vpop.f32.mrb[5].mxu0  ;;  %551 = vmatmul.mubr.bf16.vlgmr.msra.gmra.mrb[0].mxu1 %v3528_v19  ;;  %v3055_v21 = vld [vmem:[#allocation5 + $0x350] ss:$8 sps:$4 sm:$0xff]  }
 0x16a   : > { %v392_v24 = vadd.f32 %v391_v23, %v250_v6  ;;  %v393_v25 = vpop.f32.mrb[6].mxu0  ;;  %560 = vmatprep.mubr.bf16.mxu1 %v3307_v0  ;;  %v3044_v0 = vld [vmem:[#allocation5 + $0x380] ss:$8 sps:$4 sm:$0xff]  }
 0x16b   : > { %v394_v26 = vadd.f32 %v393_v25, %v246_v5  ;;  %v395_v27 = vpop.f32.mrb[7].mxu0  ;;  %v402_v29 = vmax.f32 %v390_v22, 0.0  ;;  %2562 = vmatprep.subr.bf16.mxu1 %v3044_v0  ;;  %v3056_v22 = vld [vmem:[#allocation5 + $0x3e0] ss:$8 sps:$4 sm:$0xff]   ;;  %v3059_v25 = vld [vmem:[#allocation5 + $0x370] ss:$8 sps:$4 sm:$0xff]  }
 0x16c   : > { %v396_v28 = vadd.f32 %v395_v27, %v250_v6  ;;  %v403_v31 = vmax.f32 %v392_v24, 0.0  ;;  %2563 = vmatpush3.bf16.msra.mxu1 %v3045_v39  ;;  %v3057_v23 = vld [vmem:[#allocation5 + $0x360] ss:$8 sps:$4 sm:$0xff]   ;;  %v3058_v24 = vld [vmem:[#allocation5 + $0x3f0] ss:$8 sps:$4 sm:$0xff]  }
 0x16d   : > { %v404_v30 = vmax.f32 %v394_v26, 0.0  ;;  %2564 = vmatprep.subr.bf16.mxu1 %v3046_v40  ;;  %v3060_v26 = vld [vmem:[#allocation5 + $0x400] ss:$8 sps:$4 sm:$0xff]   ;;  %v617_v27 = vld [vmem:[#allocation7 + $0x4] sm:$0x3] }
 0x16e   : > { %v405_v32 = vmax.f32 %v396_v28, 0.0  ;;  %v622_v28 = vrot.slane %v617_v27, %v3522_v2  ;;  %v3061_v2 = vld [vmem:[#allocation5 + $0x410] ss:$8 sps:$4 sm:$0xff]  }
 0x16f   : > { %v3534_v33 = vpack.c.bf16 %v404_v30, %v402_v29  ;;  %v626_v29 = vrot.slane %v617_v27, %v3524_v4 }
 0x170   : > { %v3536_v34 = vpack.c.bf16 %v405_v32, %v403_v31  ;;  %2565 = vmatpush3.bf16.msra.mxu1 %v3047_v41 }
 0x171   : > { %561 = vmatmul.mubr.bf16.gmra.mrb[4].mxu1 %v3534_v33  ;;  %2566 = vmatprep.subr.bf16.mxu1 %v3048_v42 }
 0x174   : > { %2567 = vmatpush3.bf16.msra.mxu1 %v3049_v43 }
 0x175   : > { %2568 = vmatprep.subr.bf16.mxu1 %v3050_v44 }
 0x178   : > { %2569 = vmatpush3.bf16.msra.mxu1 %v3051_v45 }
 0x179   : > { %2570 = vmatprep.subr.bf16.mxu1 %v3052_v46 }
 0x17c   : > { %2571 = vmatpush3.bf16.msra.mxu1 %v3053_v47 }
 0x17d   : > { %2572 = vmatprep.subr.bf16.mxu1 %v3054_v48 }
 0x180   : > { %2573 = vmatpush3.bf16.msra.mxu1 %v3055_v21 }
 0x181   : > { %2574 = vmatprep.subr.bf16.mxu1 %v3056_v22 }
 0x184   : > { %2575 = vmatpush3.bf16.msra.mxu1 %v3057_v23 }
 0x185   : > { %2576 = vmatprep.subr.bf16.mxu1 %v3058_v24 }
 0x188   : > { %2577 = vmatpush3.bf16.msra.mxu1 %v3059_v25 }
 0x189   : > { %2698 = vmatprep.subr.bf16.mxu1 %v3060_v26 }
 0x23c   : > { %v552_v52 = vpop.f32.mrb[0].mxu1 }
 0x23d   : > { %v553_v53 = vadd.f32 %v552_v52, %v431_v50  ;;  %v554_v54 = vpop.f32.mrb[1].mxu1 }
 0x23e   : > { %v555_v55 = vadd.f32 %v554_v54, %v435_v51  ;;  %v556_v56 = vpop.f32.mrb[2].mxu1  ;;  %v3062_v54 = vld [vmem:[#allocation5 + $0x420] ss:$8 sps:$4 sm:$0xff]  }
 0x23f   : > { %v557_v57 = vadd.f32 %v556_v56, %v431_v50  ;;  %v558_v58 = vpop.f32.mrb[3].mxu1  ;;  %v571_v60 = vmax.f32 %v553_v53, 0.0 }
 0x240   : > { %v559_v59 = vadd.f32 %v558_v58, %v435_v51  ;;  %v572_v62 = vmax.f32 %v555_v55, 0.0 }
 0x241   : > { %v573_v61 = vmax.f32 %v557_v57, 0.0 }
 0x242   : > { %v574_v63 = vmax.f32 %v559_v59, 0.0  ;;  %v3063_v59 = vld [vmem:[#allocation5 + $0x430] ss:$8 sps:$4 sm:$0xff]  }
 0x243   : > { %v579_v1 = vpack.c.bf16 %v573_v61, %v571_v60  ;;  %v3064_v60 = vld [vmem:[#allocation5 + $0x440] ss:$8 sps:$4 sm:$0xff]   ;;  %v3065_v61 = vld [vmem:[#allocation5 + $0x450] ss:$8 sps:$4 sm:$0xff]  }
 0x244   : > { %v580_v3 = vpack.c.bf16 %v574_v63, %v572_v62  ;;  %v562_v5 = vpop.f32.mrb[4].mxu1  ;;  %v3066_v62 = vld [vmem:[#allocation5 + $0x460] ss:$8 sps:$4 sm:$0xff]   ;;  %v3067_v63 = vld [vmem:[#allocation5 + $0x470] ss:$8 sps:$4 sm:$0xff]  }
 0x245   : > { %v563_v6 = vadd.f32 %v562_v5, %v431_v50  ;;  %v564_v7 = vpop.f32.mrb[5].mxu1  ;;  %v3085_v5 = vld [vmem:[#allocation5 + $0x510] ss:$8 sps:$4 sm:$0xff]  }
 0x246   : > { %v565_v8 = vadd.f32 %v564_v7, %v435_v51  ;;  %v566_v9 = vpop.f32.mrb[6].mxu1  ;;  %821 = vmatprep.mubr.bf16.mxu0 %v580_v3  ;;  %v3084_v3 = vld [vmem:[#allocation5 + $0x500] ss:$8 sps:$4 sm:$0xff]   ;;  %v3087_v7 = vld [vmem:[#allocation5 + $0x530] ss:$8 sps:$4 sm:$0xff]  }
 0x247   : > { %v567_v10 = vadd.f32 %v566_v9, %v431_v50  ;;  %v568_v11 = vpop.f32.mrb[7].mxu1  ;;  %822 = vmatmul.mubr.bf16.vlgmr.msra.gmra.mrb[8].mxu0 %v579_v1  ;;  %v575_v13 = vmax.f32 %v563_v6, 0.0  ;;  %v3068_v1 = vld [vmem:[#allocation5 + $0x680] ss:$8 sps:$4 sm:$0xff]   ;;  %2718 = vmatprep.subr.bf16.mxu0 %v3084_v3  ;;  %v3089_v9 = vld [vmem:[#allocation5 + $0x550] ss:$8 sps:$4 sm:$0xff]  }
 0x248   : > { %v569_v12 = vadd.f32 %v568_v11, %v435_v51  ;;  %v576_v15 = vmax.f32 %v565_v8, 0.0  ;;  %2719 = vmatpush3.bf16.msra.mxu0 %v3084_v3  ;;  %v3086_v6 = vld [vmem:[#allocation5 + $0x520] ss:$8 sps:$4 sm:$0xff]   ;;  %v2449_v11 = vld [vmem:[#allocation7 + $0x6] ss:$0 sm:$0xff] }
 0x249   : > { %v577_v14 = vmax.f32 %v567_v10, 0.0  ;;  %2720 = vmatprep.subr.bf16.mxu0 %v3085_v5  ;;  %v3088_v8 = vld [vmem:[#allocation5 + $0x540] ss:$8 sps:$4 sm:$0xff]   ;;  %v3095_v3 = vld [vmem:[#allocation5 + $0x730] ss:$8 sps:$4 sm:$0xff]  }
 0x24a   : > { %v578_v16 = vmax.f32 %v569_v12, 0.0 }
 0x24b   : > { %v581_v17 = vpack.c.bf16 %v577_v14, %v575_v13 }
 0x24c   : > { %v582_v18 = vpack.c.bf16 %v578_v16, %v576_v15  ;;  %2721 = vmatpush3.bf16.msra.mxu0 %v3085_v5  ;;  %v3096_v5 = vld [vmem:[#allocation5 + $0x740] ss:$8 sps:$4 sm:$0xff]  }
 0x24d   : > { %2722 = vmatprep.subr.bf16.mxu0 %v3086_v6 }
 0x24e   : > { %831 = vmatprep.mubr.bf16.mxu0 %v582_v18 }
 0x24f   : > { %832 = vmatmul.mubr.bf16.gmra.mrb[12].mxu0 %v581_v17 }
 0x250   : > { %2723 = vmatpush3.bf16.msra.mxu0 %v3086_v6  ;;  %v3097_v6 = vld [vmem:[#allocation5 + $0x750] ss:$8 sps:$4 sm:$0xff]  }
 0x251   : > { %2724 = vmatprep.subr.bf16.mxu0 %v3087_v7 }
 0x254   : > { %2725 = vmatpush3.bf16.msra.mxu0 %v3087_v7  ;;  %v3098_v7 = vld [vmem:[#allocation5 + $0x760] ss:$8 sps:$4 sm:$0xff]  }
 0x255   : > { %2726 = vmatprep.subr.bf16.mxu0 %v3088_v8 }
 0x258   : > { %2727 = vmatpush3.bf16.msra.mxu0 %v3088_v8 }
 0x259   : > { %2728 = vmatprep.subr.bf16.mxu0 %v3089_v9 }
 0x25c   : > { %2729 = vmatpush3.bf16.msra.mxu0 %v3089_v9  ;;  %v2484_v9 = vld [vmem:[#allocation7 + $0xc] ss:$0 sm:$0xff] }
 0x31a   : > { %v823_v30 = vpop.f32.mrb[8].mxu0 }
 0x31b   : > { %v824_v31 = vadd.f32 %v823_v30, %v622_v28  ;;  %v825_v32 = vpop.f32.mrb[9].mxu0 }
 0x31c   : > { %v826_v35 = vadd.f32 %v825_v32, %v626_v29  ;;  %v827_v36 = vpop.f32.mrb[10].mxu0 }
 0x31d   : > { %v828_v37 = vadd.f32 %v827_v36, %v622_v28  ;;  %v829_v38 = vpop.f32.mrb[11].mxu0  ;;  %v842_v39 = vmax.f32 %v824_v31, 0.0  ;;  %v3069_v36 = vld [vmem:[#allocation5 + $0x600] ss:$8 sps:$4 sm:$0xff]  }
 0x31e   : > { %v830_v0 = vadd.f32 %v829_v38, %v626_v29  ;;  %v843_v41 = vmax.f32 %v826_v35, 0.0  ;;  %v3070_v38 = vld [vmem:[#allocation5 + $0x690] ss:$8 sps:$4 sm:$0xff]  }
 0x31f   : > { %v844_v40 = vmax.f32 %v828_v37, 0.0 }
 0x320   : > { %v845_v42 = vmax.f32 %v830_v0, 0.0  ;;  %v3071_v0 = vld [vmem:[#allocation5 + $0x610] ss:$8 sps:$4 sm:$0xff]  }
 0x321   : > { %v850_v43 = vpack.c.bf16 %v844_v40, %v842_v39  ;;  %v3072_v39 = vld [vmem:[#allocation5 + $0x6a0] ss:$8 sps:$4 sm:$0xff]  }
 0x322   : > { %v851_v44 = vpack.c.bf16 %v845_v42, %v843_v41  ;;  %v833_v45 = vpop.f32.mrb[12].mxu0  ;;  %v3073_v40 = vld [vmem:[#allocation5 + $0x620] ss:$8 sps:$4 sm:$0xff]   ;;  %v3074_v41 = vld [vmem:[#allocation5 + $0x6b0] ss:$8 sps:$4 sm:$0xff]  }
 0x323   : > { %v834_v46 = vadd.f32 %v833_v45, %v622_v28  ;;  %v835_v47 = vpop.f32.mrb[13].mxu0  ;;  %v3075_v42 = vld [vmem:[#allocation5 + $0x630] ss:$8 sps:$4 sm:$0xff]  }
 0x324   : > { %v836_v48 = vadd.f32 %v835_v47, %v626_v29  ;;  %v837_v4 = vpop.f32.mrb[14].mxu0  ;;  %1023 = vmatprep.mubr.bf16.mxu1 %v851_v44  ;;  %v3077_v44 = vld [vmem:[#allocation5 + $0x640] ss:$8 sps:$4 sm:$0xff]   ;;  %v3078_v45 = vld [vmem:[#allocation5 + $0x6d0] ss:$8 sps:$4 sm:$0xff]  }
 0x325   : > { %v838_v49 = vadd.f32 %v837_v4, %v622_v28  ;;  %v839_v50 = vpop.f32.mrb[15].mxu0  ;;  %1024 = vmatmul.mubr.bf16.vlgmr.msra.gmra.mrb[8].mxu1 %v850_v43  ;;  %v846_v52 = vmax.f32 %v834_v46, 0.0  ;;  %v3076_v43 = vld [vmem:[#allocation5 + $0x6c0] ss:$8 sps:$4 sm:$0xff]   ;;  %v3079_v46 = vld [vmem:[#allocation5 + $0x650] ss:$8 sps:$4 sm:$0xff]  }
 0x326   : > { %v840_v51 = vadd.f32 %v839_v50, %v626_v29  ;;  %2699 = vmatpush3.bf16.msra.mxu1 %v3060_v26  ;;  %v847_v55 = vmax.f32 %v836_v48, 0.0  ;;  %v3080_v47 = vld [vmem:[#allocation5 + $0x6e0] ss:$8 sps:$4 sm:$0xff]   ;;  %v3083_v48 = vld [vmem:[#allocation5 + $0x670] ss:$8 sps:$4 sm:$0xff]  }
 0x327   : > { %v848_v53 = vmax.f32 %v838_v49, 0.0  ;;  %2700 = vmatprep.subr.bf16.mxu1 %v3061_v2  ;;  %v3090_v4 = vld [vmem:[#allocation5 + $0x560] ss:$8 sps:$4 sm:$0xff]   ;;  %v3091_v49 = vld [vmem:[#allocation5 + $0x570] ss:$8 sps:$4 sm:$0xff]  }
 0x328   : > { %v849_v56 = vmax.f32 %v840_v51, 0.0  ;;  %2730 = vmatprep.subr.bf16.mxu0 %v3090_v4  ;;  %v3092_v50 = vld [vmem:[#allocation5 + $0x700] ss:$8 sps:$4 sm:$0xff]  }
 0x329   : > { %v852_v57 = vpack.c.bf16 %v848_v53, %v846_v52  ;;  %2731 = vmatpush3.bf16.msra.mxu0 %v3090_v4  ;;  %v2466_v51 = vld [vmem:[#allocation7 + $0x8] ss:$0 sm:$0xff] }
 0x32a   : > { %v853_v58 = vpack.c.bf16 %v849_v56, %v847_v55  ;;  %2701 = vmatpush3.bf16.msra.mxu1 %v3061_v2  ;;  %v3082_v2 = vld [vmem:[#allocation5 + $0x6f0] ss:$8 sps:$4 sm:$0xff]   ;;  %2732 = vmatprep.subr.bf16.mxu0 %v3091_v49 }
 0x32b   : > { %2702 = vmatprep.subr.bf16.mxu1 %v3062_v54 }
 0x32c   : > { %1031 = vmatprep.mubr.bf16.mxu1 %v853_v58 }
 0x32d   : > { %1032 = vmatmul.mubr.bf16.gmra.mrb[12].mxu1 %v852_v57  ;;  %2733 = vmatpush3.bf16.msra.mxu0 %v3091_v49 }
 0x32e   : > { %2703 = vmatpush3.bf16.msra.mxu1 %v3062_v54  ;;  %2738 = vmatprep.subr.bf16.mxu0 %v3092_v50 }
 0x32f   : > { %2704 = vmatprep.subr.bf16.mxu1 %v3063_v59 }
 0x332   : > { %2705 = vmatpush3.bf16.msra.mxu1 %v3063_v59 }
 0x333   : > { %2706 = vmatprep.subr.bf16.mxu1 %v3064_v60 }
 0x336   : > { %2707 = vmatpush3.bf16.msra.mxu1 %v3064_v60 }
 0x337   : > { %2708 = vmatprep.subr.bf16.mxu1 %v3065_v61 }
 0x33a   : > { %2709 = vmatpush3.bf16.msra.mxu1 %v3065_v61 }
 0x33b   : > { %2710 = vmatprep.subr.bf16.mxu1 %v3066_v62 }
 0x33e   : > { %2711 = vmatpush3.bf16.msra.mxu1 %v3066_v62 }
 0x33f   : > { %2712 = vmatprep.subr.bf16.mxu1 %v3067_v63 }
 0x342   : > { %2713 = vmatpush3.bf16.msra.mxu1 %v3067_v63  ;;  %v3093_v63 = vld [vmem:[#allocation5 + $0x710] ss:$8 sps:$4 sm:$0xff]  }
 0x343   : > { %2610 = vmatprep.subr.bf16.mxu1 %v3068_v1  ;;  %v3094_v1 = vld [vmem:[#allocation5 + $0x720] ss:$8 sps:$4 sm:$0xff]  }
 0x3f8   : > { %v2578_v10 = vpop.f32.mrb[8].mxu1 }
 0x3f9   : > { %v2579_v12 = vpop.f32.mrb[9].mxu1 }
 0x3fa   : > { %v2580_v13 = vadd.f32 %v2579_v12, %v2578_v10  ;;  %v2581_v14 = vpop.f32.mrb[10].mxu1 }
 0x3fb   : > { %v2582_v15 = vpop.f32.mrb[11].mxu1 }
 0x3fc   : > { %v1026_v16 = vadd.f32 %v2580_v13, %v2449_v11  ;;  %v2583_v17 = vadd.f32 %v2582_v15, %v2581_v14 }
 0x3fe   : > { %v1029_v18 = vadd.f32 %v2583_v17, %v2449_v11  ;;  %v1040_v21 = vmax.f32 %v1026_v16, 0.0  ;;  %v3100_v17 = vld [vmem:[#allocation5 + $0x800] ss:$8 sps:$4 sm:$0xff]  }
 0x400   : > { %v1041_v22 = vmax.f32 %v1029_v18, 0.0  ;;  %v2584_v23 = vpop.f32.mrb[12].mxu1 }
 0x401   : > { %v2585_v24 = vpop.f32.mrb[13].mxu1 }
 0x402   : > { %v2586_v25 = vadd.f32 %v2585_v24, %v2584_v23  ;;  %v2587_v26 = vpop.f32.mrb[14].mxu1  ;;  %v1044_v27 = vpack.c.bf16 %v1041_v22, %v1040_v21 }
 0x403   : > { %v2588_v28 = vpop.f32.mrb[15].mxu1 }
 0x404   : > { %v1034_v29 = vadd.f32 %v2586_v25, %v2449_v11  ;;  %v2589_v30 = vadd.f32 %v2588_v28, %v2587_v26  ;;  %2714 = vmatprep.mubr.bf16.mxu1 %v1044_v27 }
 0x406   : > { %v1037_v31 = vadd.f32 %v2589_v30, %v2449_v11  ;;  %v1042_v32 = vmax.f32 %v1034_v29, 0.0  ;;  %v3099_v11 = vld [vmem:[#allocation5 + $0x770] ss:$8 sps:$4 sm:$0xff]  }
 0x408   : > { %v1043_v35 = vmax.f32 %v1037_v31, 0.0 }
 0x40a   : > { %v1045_v37 = vpack.c.bf16 %v1043_v35, %v1042_v32 }
 0x40c   : > { %2715 = vmatmul.mubr.bf16.vlgmr.msra.gmra.mrb[16].mxu1 %v1045_v37  ;;  %v3101_v37 = vld [vmem:[#allocation5 + $0x810] ss:$8 sps:$4 sm:$0xff]  }
 0x40d   : > { %2611 = vmatpush3.bf16.msra.mxu1 %v3069_v36  ;;  %1467 = vmatprep.mubr.bf16.mxu1 %v3530_v20  ;;  %v3081_v20 = vld [vmem:[#allocation5 + $0x660] ss:$8 sps:$4 sm:$0xff]  }
 0x40e   : > { %2612 = vmatprep.subr.bf16.mxu1 %v3070_v38  ;;  %v3102_v38 = vld [vmem:[#allocation5 + $0x820] ss:$8 sps:$4 sm:$0xff]  }
 0x411   : > { %2613 = vmatpush3.bf16.msra.mxu1 %v3071_v0  ;;  %v3103_v0 = vld [vmem:[#allocation5 + $0x830] ss:$8 sps:$4 sm:$0xff]  }
 0x412   : > { %2614 = vmatprep.subr.bf16.mxu1 %v3072_v39  ;;  %v3104_v39 = vld [vmem:[#allocation5 + $0x840] ss:$8 sps:$4 sm:$0xff]  }
 0x415   : > { %2615 = vmatpush3.bf16.msra.mxu1 %v3073_v40  ;;  %v3105_v40 = vld [vmem:[#allocation5 + $0x850] ss:$8 sps:$4 sm:$0xff]  }
 0x416   : > { %2616 = vmatprep.subr.bf16.mxu1 %v3074_v41  ;;  %v3106_v41 = vld [vmem:[#allocation5 + $0x860] ss:$8 sps:$4 sm:$0xff]  }
 0x419   : > { %2617 = vmatpush3.bf16.msra.mxu1 %v3075_v42  ;;  %v3107_v42 = vld [vmem:[#allocation5 + $0x870] ss:$8 sps:$4 sm:$0xff]  }
 0x41a   : > { %2618 = vmatprep.subr.bf16.mxu1 %v3076_v43  ;;  %v3108_v43 = vld [vmem:[#allocation5 + $0x900] ss:$8 sps:$4 sm:$0xff]  }
 0x41d   : > { %2619 = vmatpush3.bf16.msra.mxu1 %v3077_v44  ;;  %v3109_v44 = vld [vmem:[#allocation5 + $0x910] ss:$8 sps:$4 sm:$0xff]  }
 0x41e   : > { %2620 = vmatprep.subr.bf16.mxu1 %v3078_v45  ;;  %v3110_v45 = vld [vmem:[#allocation5 + $0x920] ss:$8 sps:$4 sm:$0xff]  }
 0x421   : > { %2621 = vmatpush3.bf16.msra.mxu1 %v3079_v46  ;;  %v3111_v46 = vld [vmem:[#allocation5 + $0x930] ss:$8 sps:$4 sm:$0xff]  }
 0x422   : > { %2622 = vmatprep.subr.bf16.mxu1 %v3080_v47  ;;  %v3112_v47 = vld [vmem:[#allocation5 + $0x940] ss:$8 sps:$4 sm:$0xff]  }
 0x425   : > { %2623 = vmatpush3.bf16.msra.mxu1 %v3081_v20  ;;  %v3113_v20 = vld [vmem:[#allocation5 + $0x950] ss:$8 sps:$4 sm:$0xff]  }
 0x426   : > { %2624 = vmatprep.subr.bf16.mxu1 %v3082_v2  ;;  %v2501_v2 = vld [vmem:[#allocation7 + $0xe] ss:$0 sm:$0xff] }
 0x429   : > { %2625 = vmatpush3.bf16.msra.mxu1 %v3083_v48 }
 0x42a   : > { %2778 = vmatprep.subr.bf16.mxu1 %v3108_v43 }
 0x42c   : > { %1468 = vmatmul.mubr.bf16.vlgmr.msra.gmra.mrb[20].mxu1 %v3528_v19 }
 0x42d   : > { %1475 = vmatprep.mubr.bf16.mxu1 %v3536_v34  ;;  %2779 = vmatpush3.bf16.msra.mxu1 %v3108_v43 }
 0x42e   : > { %2780 = vmatprep.subr.bf16.mxu1 %v3109_v44 }
 0x431   : > { %2781 = vmatpush3.bf16.msra.mxu1 %v3109_v44 }
 0x432   : > { %2782 = vmatprep.subr.bf16.mxu1 %v3110_v45 }
 0x434   : > { %1476 = vmatmul.mubr.bf16.gmra.mrb[24].mxu1 %v3534_v33 }
 0x435   : > { %2783 = vmatpush3.bf16.msra.mxu1 %v3110_v45  ;;  %v3129_v45 = vld [vmem:[#allocation5 + $0xb50] ss:$8 sps:$4 sm:$0xff]  }
 0x436   : > { %2784 = vmatprep.subr.bf16.mxu1 %v3111_v46 }
 0x439   : > { %2785 = vmatpush3.bf16.msra.mxu1 %v3111_v46  ;;  %v3130_v46 = vld [vmem:[#allocation5 + $0xb60] ss:$8 sps:$4 sm:$0xff]  }
 0x43a   : > { %2786 = vmatprep.subr.bf16.mxu1 %v3112_v47 }
 0x43d   : > { %2787 = vmatpush3.bf16.msra.mxu1 %v3112_v47  ;;  %v3131_v47 = vld [vmem:[#allocation5 + $0xb70] ss:$8 sps:$4 sm:$0xff]  }
 0x43e   : > { %2788 = vmatprep.subr.bf16.mxu1 %v3113_v20 }
 0x441   : > { %2789 = vmatpush3.bf16.msra.mxu1 %v3113_v20  ;;  %v3132_v20 = vld [vmem:[#allocation5 + $0xc00] ss:$8 sps:$4 sm:$0xff]  }
 0x4df   : > { %v2716_v52 = vpop.f32.mrb[16].mxu1 }
 0x4e0   : > { %v1162_v53 = vadd.f32 %v2716_v52, %v2466_v51  ;;  %v1153_v54 = vpop.f32.mrb[17].mxu1 }
 0x4e1   : > { %v1154_v55 = vadd.f32 %v2466_v51, %v1153_v54  ;;  %v2717_v56 = vpop.f32.mrb[18].mxu1 }
 0x4e2   : > { %v1165_v57 = vadd.f32 %v2717_v56, %v2466_v51  ;;  %v1156_v19 = vpop.f32.mrb[19].mxu1  ;;  %v1170_v34 = vmax.f32 %v1162_v53, 0.0 }
 0x4e3   : > { %v1157_v58 = vadd.f32 %v2466_v51, %v1156_v19  ;;  %v1168_v33 = vmax.f32 %v1154_v55, 0.0 }
 0x4e4   : > { %v1171_v59 = vmax.f32 %v1165_v57, 0.0 }
 0x4e5   : > { %v1169_v60 = vmax.f32 %v1157_v58, 0.0 }
 0x4e6   : > { %v1173_v61 = vpack.c.bf16 %v1171_v59, %v1170_v34  ;;  %v3114_v59 = vld [vmem:[#allocation5 + $0x960] ss:$8 sps:$4 sm:$0xff]  }
 0x4e7   : > { %v1172_v62 = vpack.c.bf16 %v1169_v60, %v1168_v33  ;;  %2790 = vmatprep.subr.bf16.mxu1 %v3114_v59  ;;  %v3115_v33 = vld [vmem:[#allocation5 + $0x970] ss:$8 sps:$4 sm:$0xff]   ;;  %v3116_v60 = vld [vmem:[#allocation5 + $0xa00] ss:$8 sps:$4 sm:$0xff]  }
 0x4e8   : > { %2791 = vmatpush3.bf16.msra.mxu1 %v3114_v59 }
 0x4e9   : > { %2734 = vmatprep.mubr.bf16.mxu0 %v1172_v62  ;;  %2792 = vmatprep.subr.bf16.mxu1 %v3115_v33  ;;  %v2510_v62 = vld [vmem:[#allocation7 + $0x10] ss:$0 sm:$0xff] }
 0x4ea   : > { %2735 = vmatmul.mubr.bf16.vlgmr.msra.gmra.mrb[16].mxu0 %v1173_v61  ;;  %v2475_v61 = vld [vmem:[#allocation7 + $0xa] ss:$0 sm:$0xff] }
 0x4eb   : > { %2739 = vmatpush3.bf16.msra.mxu0 %v3092_v50 }
 0x4ec   : > { %2740 = vmatprep.subr.bf16.mxu0 %v3093_v63  ;;  %2793 = vmatpush3.bf16.msra.mxu1 %v3115_v33 }
 0x4ed   : > { %2798 = vmatprep.subr.bf16.mxu1 %v3116_v60 }
 0x4ef   : > { %2741 = vmatpush3.bf16.msra.mxu0 %v3093_v63  ;;  %v2864_v63 = vadd.f32 %v2510_v62, %v2475_v61 }
 0x4f0   : > { %2742 = vmatprep.subr.bf16.mxu0 %v3094_v1 }
 0x4f3   : > { %2743 = vmatpush3.bf16.msra.mxu0 %v3094_v1 }
 0x4f4   : > { %2744 = vmatprep.subr.bf16.mxu0 %v3095_v3 }
 0x4f7   : > { %2745 = vmatpush3.bf16.msra.mxu0 %v3095_v3 }
 0x4f8   : > { %2746 = vmatprep.subr.bf16.mxu0 %v3096_v5 }
 0x4fb   : > { %2747 = vmatpush3.bf16.msra.mxu0 %v3096_v5 }
 0x4fc   : > { %2748 = vmatprep.subr.bf16.mxu0 %v3097_v6 }
 0x4ff   : > { %v2626_v8 = vpop.f32.mrb[20].mxu1  ;;  %2749 = vmatpush3.bf16.msra.mxu0 %v3097_v6 }
 0x500   : > { %v2627_v10 = vpop.f32.mrb[21].mxu1  ;;  %2750 = vmatprep.subr.bf16.mxu0 %v3098_v7 }
 0x501   : > { %v2628_v12 = vadd.f32 %v2627_v10, %v2626_v8  ;;  %v2629_v13 = vpop.f32.mrb[22].mxu1 }
 0x502   : > { %v2630_v14 = vpop.f32.mrb[23].mxu1 }
 0x503   : > { %v1470_v15 = vadd.f32 %v2628_v12, %v2484_v9  ;;  %v2631_v16 = vadd.f32 %v2630_v14, %v2629_v13  ;;  %2751 = vmatpush3.bf16.msra.mxu0 %v3098_v7 }
 0x504   : > { %2752 = vmatprep.subr.bf16.mxu0 %v3099_v11 }
 0x505   : > { %v1473_v18 = vadd.f32 %v2631_v16, %v2484_v9  ;;  %v1484_v21 = vmax.f32 %v1470_v15, 0.0  ;;  %v3117_v15 = vld [vmem:[#allocation5 + $0xa10] ss:$8 sps:$4 sm:$0xff]   ;;  %v3118_v16 = vld [vmem:[#allocation5 + $0xa20] ss:$8 sps:$4 sm:$0xff]  }
 0x507   : > { %v1485_v22 = vmax.f32 %v1473_v18, 0.0  ;;  %v2632_v23 = vpop.f32.mrb[24].mxu1  ;;  %2753 = vmatpush3.bf16.msra.mxu0 %v3099_v11  ;;  %v3120_v18 = vld [vmem:[#allocation5 + $0xa40] ss:$8 sps:$4 sm:$0xff]  }
 0x508   : > { %v2633_v24 = vpop.f32.mrb[25].mxu1  ;;  %2758 = vmatprep.subr.bf16.mxu0 %v3100_v17 }
 0x509   : > { %v2634_v25 = vadd.f32 %v2633_v24, %v2632_v23  ;;  %v2635_v26 = vpop.f32.mrb[26].mxu1  ;;  %v1488_v27 = vpack.c.bf16 %v1485_v22, %v1484_v21  ;;  %v3121_v21 = vld [vmem:[#allocation5 + $0xa50] ss:$8 sps:$4 sm:$0xff]   ;;  %v3122_v22 = vld [vmem:[#allocation5 + $0xa60] ss:$8 sps:$4 sm:$0xff]  }
 0x50a   : > { %v2636_v28 = vpop.f32.mrb[27].mxu1  ;;  %v3123_v23 = vld [vmem:[#allocation5 + $0xa70] ss:$8 sps:$4 sm:$0xff]   ;;  %v3124_v24 = vld [vmem:[#allocation5 + $0xb00] ss:$8 sps:$4 sm:$0xff]  }
 0x50b   : > { %v1478_v29 = vadd.f32 %v2634_v25, %v2484_v9  ;;  %v2637_v30 = vadd.f32 %v2636_v28, %v2635_v26  ;;  %2754 = vmatprep.mubr.bf16.mxu0 %v1488_v27  ;;  %v3125_v25 = vld [vmem:[#allocation5 + $0xb10] ss:$8 sps:$4 sm:$0xff]   ;;  %v3126_v26 = vld [vmem:[#allocation5 + $0xb20] ss:$8 sps:$4 sm:$0xff]  }
 0x50c   : > { %v3127_v27 = vld [vmem:[#allocation5 + $0xb30] ss:$8 sps:$4 sm:$0xff]   ;;  %v3128_v28 = vld [vmem:[#allocation5 + $0xb40] ss:$8 sps:$4 sm:$0xff]  }
 0x50d   : > { %v1481_v31 = vadd.f32 %v2637_v30, %v2484_v9  ;;  %v1486_v32 = vmax.f32 %v1478_v29, 0.0  ;;  %v2519_v29 = vld [vmem:[#allocation7 + $0x12] ss:$0 sm:$0xff] }
 0x50f   : > { %v1487_v35 = vmax.f32 %v1481_v31, 0.0 }
 0x511   : > { %v1489_v36 = vpack.c.bf16 %v1487_v35, %v1486_v32 }
 0x513   : > { %2755 = vmatmul.mubr.bf16.vlgmr.msra.gmra.mrb[20].mxu0 %v1489_v36 }
 0x514   : > { %2759 = vmatpush3.bf16.msra.mxu0 %v3100_v17  ;;  %v3119_v17 = vld [vmem:[#allocation5 + $0xa30] ss:$8 sps:$4 sm:$0xff]  }
 0x515   : > { %2760 = vmatprep.subr.bf16.mxu0 %v3101_v37 }
 0x518   : > { %2761 = vmatpush3.bf16.msra.mxu0 %v3101_v37 }
 0x519   : > { %2762 = vmatprep.subr.bf16.mxu0 %v3102_v38 }
 0x51c   : > { %2763 = vmatpush3.bf16.msra.mxu0 %v3102_v38 }
 0x51d   : > { %2764 = vmatprep.subr.bf16.mxu0 %v3103_v0 }
 0x520   : > { %2765 = vmatpush3.bf16.msra.mxu0 %v3103_v0 }
 0x521   : > { %2766 = vmatprep.subr.bf16.mxu0 %v3104_v39 }
 0x524   : > { %2767 = vmatpush3.bf16.msra.mxu0 %v3104_v39 }
 0x525   : > { %2768 = vmatprep.subr.bf16.mxu0 %v3105_v40 }
 0x528   : > { %2769 = vmatpush3.bf16.msra.mxu0 %v3105_v40 }
 0x529   : > { %2770 = vmatprep.subr.bf16.mxu0 %v3106_v41 }
 0x52c   : > { %2771 = vmatpush3.bf16.msra.mxu0 %v3106_v41 }
 0x52d   : > { %2772 = vmatprep.subr.bf16.mxu0 %v3107_v42 }
 0x530   : > { %2773 = vmatpush3.bf16.msra.mxu0 %v3107_v42 }
 0x531   : > { %2818 = vmatprep.subr.bf16.mxu0 %v3124_v24 }
 0x5e6   : > { %v2756_v48 = vpop.f32.mrb[20].mxu0 }
 0x5e7   : > { %v1606_v4 = vadd.f32 %v2756_v48, %v2501_v2  ;;  %v1597_v49 = vpop.f32.mrb[21].mxu0  ;;  %v3134_v48 = vld [vmem:[#allocation5 + $0xc20] ss:$8 sps:$4 sm:$0xff]  }
 0x5e8   : > { %v1598_v50 = vadd.f32 %v2501_v2, %v1597_v49  ;;  %v2757_v51 = vpop.f32.mrb[22].mxu0  ;;  %v3136_v49 = vld [vmem:[#allocation5 + $0xc40] ss:$8 sps:$4 sm:$0xff]  }
 0x5e9   : > { %v1609_v52 = vadd.f32 %v2757_v51, %v2501_v2  ;;  %v1600_v53 = vpop.f32.mrb[23].mxu0  ;;  %v1614_v55 = vmax.f32 %v1606_v4, 0.0  ;;  %v3135_v4 = vld [vmem:[#allocation5 + $0xc30] ss:$8 sps:$4 sm:$0xff]  }
 0x5ea   : > { %v1601_v54 = vadd.f32 %v2501_v2, %v1600_v53  ;;  %v1612_v57 = vmax.f32 %v1598_v50, 0.0  ;;  %v3133_v2 = vld [vmem:[#allocation5 + $0xc10] ss:$8 sps:$4 sm:$0xff]   ;;  %v2528_v50 = vld [vmem:[#allocation7 + $0x14] ss:$0 sm:$0xff] }
 0x5eb   : > { %v1615_v56 = vmax.f32 %v1609_v52, 0.0 }
 0x5ec   : > { %v1613_v19 = vmax.f32 %v1601_v54, 0.0 }
 0x5ed   : > { %v1617_v58 = vpack.c.bf16 %v1615_v56, %v1614_v55 }
 0x5ee   : > { %v1616_v34 = vpack.c.bf16 %v1613_v19, %v1612_v57 }
 0x5f0   : > { %2774 = vmatprep.mubr.bf16.mxu0 %v1616_v34 }
 0x5f1   : > { %2775 = vmatmul.mubr.bf16.vlgmr.msra.gmra.mrb[16].mxu0 %v1617_v58 }
 0x5f2   : > { %2819 = vmatpush3.bf16.msra.mxu0 %v3124_v24 }
 0x5f3   : > { %2820 = vmatprep.subr.bf16.mxu0 %v3125_v25 }
 0x5f6   : > { %2821 = vmatpush3.bf16.msra.mxu0 %v3125_v25 }
 0x5f7   : > { %2822 = vmatprep.subr.bf16.mxu0 %v3126_v26 }
 0x5fa   : > { %2823 = vmatpush3.bf16.msra.mxu0 %v3126_v26 }
 0x5fb   : > { %2824 = vmatprep.subr.bf16.mxu0 %v3127_v27 }
 0x5fe   : > { %2825 = vmatpush3.bf16.msra.mxu0 %v3127_v27 }
 0x5ff   : > { %2826 = vmatprep.subr.bf16.mxu0 %v3128_v28 }
 0x602   : > { %2827 = vmatpush3.bf16.msra.mxu0 %v3128_v28 }
 0x603   : > { %2828 = vmatprep.subr.bf16.mxu0 %v3129_v45 }
 0x606   : > { %2829 = vmatpush3.bf16.msra.mxu0 %v3129_v45 }
 0x607   : > { %2830 = vmatprep.subr.bf16.mxu0 %v3130_v46 }
 0x60a   : > { %2831 = vmatpush3.bf16.msra.mxu0 %v3130_v46 }
 0x60b   : > { %2832 = vmatprep.subr.bf16.mxu0 %v3131_v47 }
 0x60e   : > { %2833 = vmatpush3.bf16.msra.mxu0 %v3131_v47 }
 0x6c4   : > { %v2776_v1 = vpop.f32.mrb[16].mxu0 }
 0x6c5   : > { %v2858_v3 = vadd.f32 %v2776_v1, %v2475_v61  ;;  %v1725_v5 = vpop.f32.mrb[17].mxu0 }
 0x6c6   : > { %v2860_v6 = vadd.f32 %v2475_v61, %v1725_v5  ;;  %v2777_v7 = vpop.f32.mrb[18].mxu0  ;;  %v3137_v5 = vld [vmem:[#allocation5 + $0xc50] ss:$8 sps:$4 sm:$0xff]  }
 0x6c7   : > { %v3547_v8 = vadd.f32 %v2858_v3, %v2510_v62  ;;  %v3549_v9 = vadd.f32 %v2864_v63, %v2777_v7  ;;  %v1728_v10 = vpop.f32.mrb[19].mxu0  ;;  %v3139_v7 = vld [vmem:[#allocation5 + $0xc70] ss:$8 sps:$4 sm:$0xff]  }
 0x6c8   : > { %v3551_v11 = vadd.f32 %v2860_v6, %v2510_v62  ;;  %v3553_v12 = vadd.f32 %v2864_v63, %v1728_v10  ;;  %v3138_v6 = vld [vmem:[#allocation5 + $0xc60] ss:$8 sps:$4 sm:$0xff]   ;;  %v2537_v10 = vld [vmem:[#allocation7 + $0x16] ss:$0 sm:$0xff] }
 0x6c9   : > { %v1745_v14 = vpack.c.bf16 %v3549_v9, %v3547_v8 }
 0x6ca   : > { %v1744_v13 = vpack.c.bf16 %v3553_v12, %v3551_v11 }
 0x6cc   : > { %2794 = vmatprep.mubr.bf16.mxu1 %v1744_v13 }
 0x6cd   : > { %2795 = vmatmul.mubr.bf16.vlgmr.msra.gmra.mrb[28].mxu1 %v1745_v14 }
 0x6ce   : > { %2799 = vmatpush3.bf16.msra.mxu1 %v3116_v60 }
 0x6cf   : > { %2800 = vmatprep.subr.bf16.mxu1 %v3117_v15 }
 0x6d2   : > { %2801 = vmatpush3.bf16.msra.mxu1 %v3117_v15 }
 0x6d3   : > { %2802 = vmatprep.subr.bf16.mxu1 %v3118_v16 }
 0x6d6   : > { %2803 = vmatpush3.bf16.msra.mxu1 %v3118_v16 }
 0x6d7   : > { %2804 = vmatprep.subr.bf16.mxu1 %v3119_v17 }
 0x6da   : > { %2805 = vmatpush3.bf16.msra.mxu1 %v3119_v17 }
 0x6db   : > { %2806 = vmatprep.subr.bf16.mxu1 %v3120_v18 }
 0x6de   : > { %2807 = vmatpush3.bf16.msra.mxu1 %v3120_v18 }
 0x6df   : > { %2808 = vmatprep.subr.bf16.mxu1 %v3121_v21 }
 0x6e2   : > { %2809 = vmatpush3.bf16.msra.mxu1 %v3121_v21 }
 0x6e3   : > { %2810 = vmatprep.subr.bf16.mxu1 %v3122_v22 }
 0x6e6   : > { %2811 = vmatpush3.bf16.msra.mxu1 %v3122_v22 }
 0x6e7   : > { %2812 = vmatprep.subr.bf16.mxu1 %v3123_v23 }
 0x6ea   : > { %2813 = vmatpush3.bf16.msra.mxu1 %v3123_v23 }
 0x6eb   : > { %2838 = vmatprep.subr.bf16.mxu1 %v3132_v20 }
 0x7a0   : > { %v2796_v30 = vpop.f32.mrb[28].mxu1 }
 0x7a1   : > { %v1853_v31 = vpop.f32.mrb[29].mxu1  ;;  %v1862_v36 = vadd.f32 %v2796_v30, %v2519_v29 }
 0x7a2   : > { %v1854_v32 = vadd.f32 %v2519_v29, %v1853_v31  ;;  %v2797_v35 = vpop.f32.mrb[30].mxu1 }
 0x7a3   : > { %v1865_v37 = vadd.f32 %v2797_v35, %v2519_v29  ;;  %v1856_v38 = vpop.f32.mrb[31].mxu1  ;;  %v1870_v42 = vmax.f32 %v1862_v36, 0.0  ;;  %v2546_v35 = vld [vmem:[#allocation7 + $0x18] ss:$0 sm:$0xff] }
 0x7a4   : > { %v1857_v0 = vadd.f32 %v2519_v29, %v1856_v38  ;;  %v1868_v40 = vmax.f32 %v1854_v32, 0.0 }
 0x7a5   : > { %v1871_v39 = vmax.f32 %v1865_v37, 0.0 }
 0x7a6   : > { %v1869_v41 = vmax.f32 %v1857_v0, 0.0 }
 0x7a7   : > { %v1873_v44 = vpack.c.bf16 %v1871_v39, %v1870_v42 }
 0x7a8   : > { %v1872_v43 = vpack.c.bf16 %v1869_v41, %v1868_v40 }
 0x7aa   : > { %2814 = vmatprep.mubr.bf16.mxu1 %v1872_v43 }
 0x7ab   : > { %2815 = vmatmul.mubr.bf16.vlgmr.msra.gmra.mrb[32].mxu1 %v1873_v44 }
 0x7ac   : > { %2839 = vmatpush3.bf16.msra.mxu1 %v3132_v20 }
 0x7ad   : > { %2840 = vmatprep.subr.bf16.mxu1 %v3133_v2 }
 0x7b0   : > { %2841 = vmatpush3.bf16.msra.mxu1 %v3133_v2 }
 0x7b1   : > { %2842 = vmatprep.subr.bf16.mxu1 %v3134_v48 }
 0x7b4   : > { %2843 = vmatpush3.bf16.msra.mxu1 %v3134_v48 }
 0x7b5   : > { %2844 = vmatprep.subr.bf16.mxu1 %v3135_v4 }
 0x7b8   : > { %2845 = vmatpush3.bf16.msra.mxu1 %v3135_v4 }
 0x7b9   : > { %2846 = vmatprep.subr.bf16.mxu1 %v3136_v49 }
 0x7bc   : > { %2847 = vmatpush3.bf16.msra.mxu1 %v3136_v49 }
 0x7bd   : > { %2848 = vmatprep.subr.bf16.mxu1 %v3137_v5 }
 0x7c0   : > { %2849 = vmatpush3.bf16.msra.mxu1 %v3137_v5 }
 0x7c1   : > { %2850 = vmatprep.subr.bf16.mxu1 %v3138_v6 }
 0x7c4   : > { %2851 = vmatpush3.bf16.msra.mxu1 %v3138_v6 }
 0x7c5   : > { %2852 = vmatprep.subr.bf16.mxu1 %v3139_v7 }
 0x7c8   : > { %2853 = vmatpush3.bf16.msra.mxu1 %v3139_v7 }
 0x87e   : > { %v2816_v51 = vpop.f32.mrb[32].mxu1 }
 0x87f   : > { %v1990_v52 = vadd.f32 %v2816_v51, %v2528_v50  ;;  %v1981_v53 = vpop.f32.mrb[33].mxu1 }
 0x880   : > { %v1982_v54 = vadd.f32 %v2528_v50, %v1981_v53  ;;  %v2817_v55 = vpop.f32.mrb[34].mxu1 }
 0x881   : > { %v1998_v56 = vmax.f32 %v1990_v52, 0.0  ;;  %v1993_v57 = vadd.f32 %v2817_v55, %v2528_v50  ;;  %v1984_v19 = vpop.f32.mrb[35].mxu1 }
 0x882   : > { %v1996_v58 = vmax.f32 %v1982_v54, 0.0  ;;  %v1985_v34 = vadd.f32 %v2528_v50, %v1984_v19 }
 0x883   : > { %v1999_v59 = vmax.f32 %v1993_v57, 0.0  ;;  %v2002_v60 = vadd.f32 %v1998_v56, %v1870_v42 }
 0x884   : > { %v1997_v33 = vmax.f32 %v1985_v34, 0.0  ;;  %v2000_v62 = vadd.f32 %v1996_v58, %v1868_v40 }
 0x885   : > { %v2003_v61 = vadd.f32 %v1999_v59, %v1871_v39 }
 0x886   : > { %v2001_v63 = vadd.f32 %v1997_v33, %v1869_v41 }
 0x887   : > { %v2005_v1 = vpack.c.bf16 %v2003_v61, %v2002_v60 }
 0x888   : > { %v2004_v3 = vpack.c.bf16 %v2001_v63, %v2000_v62 }
 0x88a   : > { %2834 = vmatprep.mubr.bf16.mxu0 %v2004_v3 }
 0x88b   : > { %2835 = vmatmul.mubr.bf16.vlgmr.msra.gmra.mrb[24].mxu0 %v2005_v1 }
 0x95e   : > { %v2836_v13 = vpop.f32.mrb[24].mxu0 }
 0x95f   : > { %v2122_v14 = vadd.f32 %v2836_v13, %v2537_v10  ;;  %v2113_v15 = vpop.f32.mrb[25].mxu0 }
 0x960   : > { %v2114_v16 = vadd.f32 %v2537_v10, %v2113_v15  ;;  %v2837_v17 = vpop.f32.mrb[26].mxu0 }
 0x961   : > { %v2130_v18 = vmax.f32 %v2122_v14, 0.0  ;;  %v2125_v21 = vadd.f32 %v2837_v17, %v2537_v10  ;;  %v2116_v22 = vpop.f32.mrb[27].mxu0 }
 0x962   : > { %v2128_v23 = vmax.f32 %v2114_v16, 0.0  ;;  %v2117_v24 = vadd.f32 %v2537_v10, %v2116_v22 }
 0x963   : > { %v2131_v25 = vmax.f32 %v2125_v21, 0.0  ;;  %v2134_v27 = vadd.f32 %v3547_v8, %v2130_v18 }
 0x964   : > { %v2129_v26 = vmax.f32 %v2117_v24, 0.0  ;;  %v2132_v29 = vadd.f32 %v3551_v11, %v2128_v23 }
 0x965   : > { %v2135_v28 = vadd.f32 %v3549_v9, %v2131_v25 }
 0x966   : > { %v2133_v30 = vadd.f32 %v3553_v12, %v2129_v26 }
 0x967   : > { %v2137_v31 = vpack.c.bf16 %v2135_v28, %v2134_v27 }
 0x968   : > { %v2136_v32 = vpack.c.bf16 %v2133_v30, %v2132_v29 }
 0x96a   : > { %2854 = vmatprep.mubr.bf16.mxu1 %v2136_v32 }
 0x96b   : > { %2855 = vmatmul.mubr.bf16.vlgmr.msra.gmra.mrb[36].mxu1 %v2137_v31 }
 0xa3e   : > { %v2856_v36 = vpop.f32.mrb[36].mxu1 }
 0xa3f   : > { %v2254_v37 = vadd.f32 %v2856_v36, %v2546_v35  ;;  %v2245_v8 = vpop.f32.mrb[37].mxu1 }
 0xa40   : > { %v2246_v9 = vadd.f32 %v2546_v35, %v2245_v8  ;;  %v2857_v11 = vpop.f32.mrb[38].mxu1 }
 0xa41   : > { %2262 = vst [vmem:[%s217_s20 + $0x10] sm:$0xff] %v2254_v37  ;;  %v2257_v12 = vadd.f32 %v2857_v11, %v2546_v35  ;;  %v2248_v38 = vpop.f32.mrb[39].mxu1 }
 0xa42   : > { %2260 = vst [vmem:[%s217_s20] sm:$0xff] %v2246_v9  ;;  %v2249_v0 = vadd.f32 %v2546_v35, %v2248_v38 }
 0xa43   : > { %2263 = vst [vmem:[%s217_s20 + $0x18] sm:$0xff] %v2257_v12 }
 0xa44   : > { %2261 = vst [vmem:[%s217_s20 + $0x8] sm:$0xff] %v2249_v0 }
 0xa45   : > { %3239 = shalt.err (!%p3236_p2)
}
 0xa46   : > { %s3240_s17 = scalar_lea.hbm %s3570_s7, 512  ;;  %s3244_s30 = scalar_lea.hbm %s3617_s3, 1024 }
 0xa47   : > { %p3241_p13 = scmp.ne.s32.totalorder %s3570_s7, %s3240_s17  ;;  %p3245_p4 = scmp.lt.u32.totalorder %s3570_s7, %s3617_s3 }
 0xa48   : > { %p3246_p7 = scmp.lt.u32.totalorder %s3244_s30, %s3240_s17  ;;  %p3248_p11 = scmp.lt.u32.totalorder %s3240_s17, %s3570_s7 }
 0xa49   : > { %p3242_p6 = pnand %p3241_p13, %p3631_p0 }
 0xa4a   : > { %p3247_p8 = por %p3246_p7, %p3245_p4 }
 0xa4b   : > { %p3243_p10 = pneg %p3242_p6 }
 0xa4c   : > { %p3249_p1 = por %p3248_p11, %p3247_p8 }
 0xa4e   : > { %p3250_p3 = pnand %p3249_p1, %p3243_p10 }
 0xa50   : > { %3253 = shalt.err (!%p3250_p3)
}
 0xa51   : > { %s3309_s18 = smov 128   ;;  %s3310_s20 = smov 8  }
 0xa52   : > { %2880 = dma.vmem_to_hbm [thread:$0]  (%p3631_p0), %s3565_s24, 512, %s3570_s7, %s2265_s16, %s3309_s18, %s3309_s18, %s3310_s20  }
 0xa53 PF: > { %s2293_s27 = sand.u32 1, %s3284_s12   ;;  %p3632_p5 = scmp.ne.s32.totalorder %s3622_s19, 0 }
 0xa54   : > { %p3633_p9 = scmp.ge.s32.totalorder %s3296_s15, 2  ;;  %s2294_s28 = scalar_lea.sflag [#allocation4], %s2293_s27 }
 0xa56   : > { %p2894_p12 = pnand %p3633_p9, %p3632_p5 }
 0xa58   : > { %3279 = dma.done.wait (!%p2894_p12), %s2294_s28, 512  }
 0xa59   : > { %3281 = vsyncadd (!%p2894_p12), %s2294_s28, 4294966784  ;;  %p17_p2 = scmp.ge.s32.totalorder %s3441_s6, 4   ;;  %s3634_s12 = smov %s3288_s13 }
 0xa5a   : > { %s3635_s13 = smov %s3292_s14  ;;  %s3636_s14 = smov %s3450_s9 }
 0xa5b   : > { %s3637_s15 = smov %s3441_s6  ;;  %19 = sbr.rel (!%p17_p2) target bundleno = 6 (0x6), region = 109 }
 0xa62   :  { %2299 = vsyncpa [#allocation3], 1 }
 0xa63   :  { %2301 = vsyncpa [#allocation3 + $0x1], 1 }
 0xa64   :  { %2302 = vsyncpa [#allocation6], 1 }
 0xa65   :  { %2303 = vsyncpa [#allocation4], 1 }
 0xa66   :  { %2305 = vsyncpa [#allocation4 + $0x1], 1 }

</bundles_post_ra>
